<compile_context>
chip_gen: v6e
topology: v6e:2x2x1
jax: 0.10.0
libtpu: 0.0.40
codegen_flags: <defaults>
</compile_context>

<pallas_src>
import jax
import jax.numpy as jnp
from jax.experimental import pallas as pl
from jax.experimental.pallas import tpu as pltpu


def _round_up(n, m):
    return ((n + m - 1) // m) * m


# ----------------------------------------------------------------------------
# Fused kernel
# ----------------------------------------------------------------------------
def _fused_cnn_kernel(x_ref, w1_ref, b1_ref, w2_ref, b2_ref,
                      wf1_ref, bf1_ref, wf2_ref, bf2_ref, out_ref):
    tb = x_ref.shape[1]          # batch tile
    cdt = w1_ref.dtype           # bf16 matmul operand dtype

    # ---- conv1 (1->16, 5x5) + bias + ReLU, x-pool folded into weights --------
    # lhs rows are y-major: row = y1*tb + b, K = ky*28 + x_in (y-im2col from the
    # wrapper).  One matmul per output-x parity; max over parity = x-maxpool.
    lhs1 = x_ref[...].reshape(24 * tb, 140)                       # bf16
    r0 = jnp.dot(lhs1, w1_ref[0], preferred_element_type=jnp.float32)
    r1 = jnp.dot(lhs1, w1_ref[1], preferred_element_type=jnp.float32)
    h1 = jnp.maximum(r0, r1) + b1_ref[...]                        # (24*tb, 192) f32
    h1 = jnp.maximum(h1, 0.0).astype(cdt)                         # ReLU -> bf16

    # ---- maxpool1 over y (leading-dim pair max, layout-free) ------------------
    h1 = h1.reshape(12, 2, tb, 192)
    p1 = jnp.maximum(h1[:, 0], h1[:, 1])                          # (12, tb, 192)

    # ---- conv2 (16->32, 5x5) + bias + ReLU, x-pool folded into weights --------
    # K = 192 (= 12 x_in * 16 c_in) per ky step, N = 256 (even|odd parity).
    # p1[dy:dy+8] is a leading-dim slab selection -> free slice, free reshape.
    acc2 = jnp.dot(p1[0:8].reshape(8 * tb, 192), w2_ref[0],
                   preferred_element_type=jnp.float32)            # (8*tb, 256)
    for dy in range(1, 5):
        acc2 = acc2 + jnp.dot(p1[dy:dy + 8].reshape(8 * tb, 192), w2_ref[dy],
                              preferred_element_type=jnp.float32)
    h2 = jnp.maximum(acc2[:, :128], acc2[:, 128:]) + b2_ref[...]  # parity max (aligned)
    h2 = jnp.maximum(h2, 0.0).astype(cdt)                         # (8*tb, 128) bf16

    # ---- maxpool2 over y + flatten (lane-concat of the 4 pooled rows) ---------
    h2 = h2.reshape(4, 2, tb, 128)
    p2 = jnp.maximum(h2[:, 0], h2[:, 1])                          # (4, tb, 128)
    flat = jnp.concatenate([p2[0], p2[1], p2[2], p2[3]], axis=-1)  # (tb, 512)

    # ---- fc1 (single K=512 matmul; NCHW flatten folded into Wf1) + ReLU -------
    hf = jnp.dot(flat, wf1_ref[...], preferred_element_type=jnp.float32) + bf1_ref[...]
    hf = jnp.maximum(hf, 0.0).astype(cdt)                         # (tb, 128)

    # ---- fc2 (padded to 128 lane-dense output columns) ------------------------
    logits = jnp.dot(hf, wf2_ref[...],
                     preferred_element_type=jnp.float32) + bf2_ref[...]
    out_ref[...] = logits.astype(out_ref.dtype)


# ----------------------------------------------------------------------------
# One-time host-side weight preparation (Toeplitz conv weights, fc1 permutation)
# ----------------------------------------------------------------------------
def prepare_params(params, dtype=jnp.bfloat16):
    # conv1: (16,1,5,5) -> (2, 140, 192): rows = ky*28 + x_in,
    # cols = x_pooled*16 + c_out, one slab per output-x parity.
    w1 = params["conv1_w"]
    w1t = jnp.transpose(w1[:, 0], (1, 2, 0))              # (ky, kx, cout) = (5,5,16)
    xi = jnp.arange(28)[:, None]
    xo = jnp.arange(12)[None, :]
    slabs1 = []
    for px in range(2):
        dx = xi - (2 * xo + px)                            # (28, 12)
        valid = (dx >= 0) & (dx < 5)
        wg = w1t[:, jnp.clip(dx, 0, 4), :]                 # (5, 28, 12, 16)
        wg = jnp.where(valid[None, :, :, None], wg, 0.0)
        slabs1.append(wg.reshape(5 * 28, 12 * 16))         # (140, 192)
    W1 = jnp.stack(slabs1, axis=0).astype(dtype)           # (2, 140, 192)
    b1t = jnp.tile(params["conv1_b"], 12).reshape(1, 192).astype(jnp.float32)

    # conv2: (32,16,5,5) -> (5, 192, 256): per-ky slabs, rows = x_in*16 + c_in,
    # cols = [even | odd] parity, each 4*32 = x_pooled*32 + c_out.
    w2 = params["conv2_w"]
    w2t = jnp.transpose(w2, (2, 3, 1, 0))                  # (ky, kx, cin, cout)
    xi2 = jnp.arange(12)[:, None]
    xo2 = jnp.arange(4)[None, :]
    slabs2 = []
    for px in range(2):
        dx = xi2 - (2 * xo2 + px)                          # (12, 4)
        valid = (dx >= 0) & (dx < 5)
        wg = w2t[:, jnp.clip(dx, 0, 4), :, :]              # (5, 12, 4, 16, 32)
        wg = jnp.where(valid[None, :, :, None, None], wg, 0.0)
        wg = jnp.transpose(wg, (0, 1, 3, 2, 4))            # (5, 12, 16, 4, 32)
        slabs2.append(wg.reshape(5, 12 * 16, 4 * 32))      # (5, 192, 128)
    W2 = jnp.concatenate(slabs2, axis=-1).astype(dtype)    # (5, 192, 256)
    b2t = jnp.tile(params["conv2_b"], 4).reshape(1, 128).astype(jnp.float32)

    # fc1: PyTorch flatten is NCHW (idx = c*16 + h*4 + w); kernel lanes are
    # h*128 + w*32 + c  ->  fold the permutation into the weight, K = 512.
    fw = params["fc1_w"].reshape(128, 32, 4, 4)            # (out, c, h, w)
    fw = jnp.transpose(fw, (2, 3, 1, 0))                   # (h, w, c, out)
    Wf1 = fw.reshape(512, 128).astype(dtype)
    bf1 = params["fc1_b"].reshape(1, 128).astype(jnp.float32)

    # fc2: zero-pad the 10 output columns to 128 lanes (lane-dense output path).
    Wf2 = jnp.zeros((128, 128), jnp.float32).at[:, :10].set(params["fc2_w"].T)
    Wf2 = Wf2.astype(dtype)
    bf2 = jnp.zeros((1, 128), jnp.float32).at[0, :10].set(params["fc2_b"])

    return (W1, b1t, W2, b2t, Wf1, bf1, Wf2, bf2)


# ----------------------------------------------------------------------------
# Wrapper
# ----------------------------------------------------------------------------
def fused_forward(x_nchw, prepped):
    W1, b1t, W2, b2t, Wf1, bf1, Wf2, bf2 = prepped
    B = x_nchw.shape[0]

    # Adaptive batch tile: saturate the MXU for large batches (cap 128 so the
    # per-step VMEM footprint stays well under every generation's limit), stay
    # tiny for small test batches.
    tb = min(128, _round_up(B, 8))
    Bp = _round_up(B, tb)

    x2 = x_nchw.reshape(B, 28, 28).astype(jnp.bfloat16)
    if Bp != B:
        x2 = jnp.pad(x2, ((0, Bp - B), (0, 0), (0, 0)))

    # y-only im2col (fold conv1's ky into the contraction, K = 5*28 = 140),
    # laid out y-major (24, Bp, 140) so every in-kernel slice/reshape touches
    # only leading (untiled) dims.
    xw = jnp.stack([x2[:, dy:dy + 24, :] for dy in range(5)], axis=2)  # (Bp,24,5,28)
    x_col = jnp.transpose(xw, (1, 0, 2, 3)).reshape(24, Bp, 140)

    out = pl.pallas_call(
        _fused_cnn_kernel,
        out_shape=jax.ShapeDtypeStruct((Bp, 128), jnp.float32),
        grid=(Bp // tb,),
        in_specs=[
            pl.BlockSpec((24, tb, 140), lambda i: (0, i, 0)),   # im2col'd image
            pl.BlockSpec((2, 140, 192), lambda i: (0, 0, 0)),   # W1 (parity, K, N)
            pl.BlockSpec((1, 192), lambda i: (0, 0)),           # b1
            pl.BlockSpec((5, 192, 256), lambda i: (0, 0, 0)),   # W2 (ky, K, N)
            pl.BlockSpec((1, 128), lambda i: (0, 0)),           # b2
            pl.BlockSpec((512, 128), lambda i: (0, 0)),         # Wf1
            pl.BlockSpec((1, 128), lambda i: (0, 0)),           # bf1
            pl.BlockSpec((128, 128), lambda i: (0, 0)),         # Wf2 (padded)
            pl.BlockSpec((1, 128), lambda i: (0, 0)),           # bf2 (padded)
        ],
        out_specs=pl.BlockSpec((tb, 128), lambda i: (i, 0)),
        compiler_params=pltpu.CompilerParams(
            dimension_semantics=("parallel",),
            vmem_limit_bytes=32 * 1024 * 1024),
    )(x_col, W1, b1t, W2, b2t, Wf1, bf1, Wf2, bf2)
    return out[:B, :10]


# ----------------------------------------------------------------------------
# Pure-JAX reference (PyTorch semantics) and parameter init
# ----------------------------------------------------------------------------
def reference_forward(x_nchw, params):
    def conv(x, w, b):
        y = jax.lax.conv_general_dilated(
            x, w, (1, 1), "VALID",
            dimension_numbers=("NCHW", "OIHW", "NCHW"))
        return y + b[None, :, None, None]

    def pool(x):
        return jnp.maximum(
            jnp.maximum(x[:, :, 0::2, 0::2], x[:, :, 0::2, 1::2]),
            jnp.maximum(x[:, :, 1::2, 0::2], x[:, :, 1::2, 1::2]))

    x = pool(jax.nn.relu(conv(x_nchw, params["conv1_w"], params["conv1_b"])))
    x = pool(jax.nn.relu(conv(x, params["conv2_w"], params["conv2_b"])))
    x = x.reshape(x.shape[0], -1)                          # NCHW flatten
    x = jax.nn.relu(x @ params["fc1_w"].T + params["fc1_b"])
    return x @ params["fc2_w"].T + params["fc2_b"]


def init_params(key):
    ks = jax.random.split(key, 8)

    def rn(k, shape, scale):
        return jax.random.normal(k, shape, jnp.float32) * scale

    # Shapes follow the PyTorch module's parameter shapes exactly.
    return {
        "conv1_w": rn(ks[0], (16, 1, 5, 5), 0.10),
        "conv1_b": rn(ks[1], (16,), 0.10),
        "conv2_w": rn(ks[2], (32, 16, 5, 5), 0.05),
        "conv2_b": rn(ks[3], (32,), 0.05),
        "fc1_w": rn(ks[4], (128, 32 * 4 * 4), 0.05),
        "fc1_b": rn(ks[5], (128,), 0.05),
        "fc2_w": rn(ks[6], (10, 128), 0.05),
        "fc2_b": rn(ks[7], (10,), 0.05),
    }


if __name__ == "__main__":
    key = jax.random.PRNGKey(0)
    k_params, k_x = jax.random.split(key)

    params = init_params(k_params)
    # MNIST-shaped input implied by the 32*4*4 classifier: (B=2, 1, 28, 28)
    x = jax.random.normal(k_x, (2, 1, 28, 28), jnp.float32)

    prepped = prepare_params(params)                       # one-time weight prep
    fwd = jax.jit(fused_forward)

    out = jax.block_until_ready(fwd(x, prepped))
    assert out.shape == (2, 10), out.shape

    # Loose tolerance: kernel uses bf16 matmul operands / activations with f32
    # MXU accumulation and f32 bias/ReLU epilogues.
    ref = reference_forward(x, params)
    max_err = float(jnp.max(jnp.abs(out - ref)))
    assert max_err < 0.1, f"max abs err vs reference: {max_err}"

    print("KERNEL_OK")
</pallas_src>

<mosaic_0001>
module attributes {stable_mosaic.version = 11 : i64} {
  func.func @_fused_cnn_kernel(%arg0: i32, %arg1: memref<24x8x140xbf16, #tpu.memory_space<vmem>>, %arg2: memref<2x140x192xbf16, #tpu.memory_space<vmem>>, %arg3: memref<1x192xf32, #tpu.memory_space<vmem>>, %arg4: memref<5x192x256xbf16, #tpu.memory_space<vmem>>, %arg5: memref<1x128xf32, #tpu.memory_space<vmem>>, %arg6: memref<512x128xbf16, #tpu.memory_space<vmem>>, %arg7: memref<1x128xf32, #tpu.memory_space<vmem>>, %arg8: memref<128x128xbf16, #tpu.memory_space<vmem>>, %arg9: memref<1x128xf32, #tpu.memory_space<vmem>>, %arg10: memref<8x128xf32, #tpu.memory_space<vmem>>) attributes {dimension_semantics = [#tpu.dimension_semantics<parallel>], iteration_bounds = array<i64: 1>, scalar_prefetch = 0 : i64, scratch_operands = 0 : i64, tpu.core_type = #tpu.core_type<tc>, window_params = [{transform_indices = @transform_0, window_bounds = array<i64: 24, 8, 140>}, {pipeline_mode = #tpu.pipeline_mode<synchronous>, transform_indices = @transform_1, window_bounds = array<i64: 2, 140, 192>}, {pipeline_mode = #tpu.pipeline_mode<synchronous>, transform_indices = @transform_2, window_bounds = array<i64: 1, 192>}, {pipeline_mode = #tpu.pipeline_mode<synchronous>, transform_indices = @transform_3, window_bounds = array<i64: 5, 192, 256>}, {pipeline_mode = #tpu.pipeline_mode<synchronous>, transform_indices = @transform_4, window_bounds = array<i64: 1, 128>}, {pipeline_mode = #tpu.pipeline_mode<synchronous>, transform_indices = @transform_5, window_bounds = array<i64: 512, 128>}, {pipeline_mode = #tpu.pipeline_mode<synchronous>, transform_indices = @transform_6, window_bounds = array<i64: 1, 128>}, {pipeline_mode = #tpu.pipeline_mode<synchronous>, transform_indices = @transform_7, window_bounds = array<i64: 128, 128>}, {pipeline_mode = #tpu.pipeline_mode<synchronous>, transform_indices = @transform_8, window_bounds = array<i64: 1, 128>}, {transform_indices = @transform_9, window_bounds = array<i64: 8, 128>}]} {
    %c0 = arith.constant 0 : index
    %c0_0 = arith.constant 0 : index
    %c0_1 = arith.constant 0 : index
    %0 = vector.load %arg1[%c0, %c0_0, %c0_1] : memref<24x8x140xbf16, #tpu.memory_space<vmem>>, vector<24x8x140xbf16>
    %1 = vector.shape_cast %0 : vector<24x8x140xbf16> to vector<192x140xbf16>
    %c0_2 = arith.constant 0 : index
    %c0_3 = arith.constant 0 : index
    %c0_4 = arith.constant 0 : index
    %2 = vector.load %arg2[%c0_2, %c0_3, %c0_4] : memref<2x140x192xbf16, #tpu.memory_space<vmem>>, vector<1x140x192xbf16>
    %3 = vector.shape_cast %2 : vector<1x140x192xbf16> to vector<140x192xbf16>
    %cst = arith.constant dense<0.000000e+00> : vector<192x192xf32>
    %4 = tpu.matmul %1, %3, %cst {dimension_numbers = #tpu.dot_dimension_numbers<[1], [0], [0], [1], [0, 0, 1, 1], [], []>} : vector<192x140xbf16>, vector<140x192xbf16>, vector<192x192xf32> -> vector<192x192xf32>
    %c1 = arith.constant 1 : index
    %c0_5 = arith.constant 0 : index
    %c0_6 = arith.constant 0 : index
    %5 = vector.load %arg2[%c1, %c0_5, %c0_6] : memref<2x140x192xbf16, #tpu.memory_space<vmem>>, vector<1x140x192xbf16>
    %6 = vector.shape_cast %5 : vector<1x140x192xbf16> to vector<140x192xbf16>
    %cst_7 = arith.constant dense<0.000000e+00> : vector<192x192xf32>
    %7 = tpu.matmul %1, %6, %cst_7 {dimension_numbers = #tpu.dot_dimension_numbers<[1], [0], [0], [1], [0, 0, 1, 1], [], []>} : vector<192x140xbf16>, vector<140x192xbf16>, vector<192x192xf32> -> vector<192x192xf32>
    %8 = arith.maximumf %4, %7 : vector<192x192xf32>
    %c0_8 = arith.constant 0 : index
    %c0_9 = arith.constant 0 : index
    %9 = vector.load %arg3[%c0_8, %c0_9] : memref<1x192xf32, #tpu.memory_space<vmem>>, vector<1x192xf32>
    %10 = vector.broadcast %9 : vector<1x192xf32> to vector<192x192xf32>
    %11 = arith.addf %8, %10 : vector<192x192xf32>
    %cst_10 = arith.constant 0.000000e+00 : f32
    %12 = vector.broadcast %cst_10 : f32 to vector<192x192xf32>
    %13 = arith.maximumf %11, %12 : vector<192x192xf32>
    %14 = arith.truncf %13 : vector<192x192xf32> to vector<192x192xbf16>
    %15 = vector.shape_cast %14 : vector<192x192xbf16> to vector<12x2x8x192xbf16>
    %16 = vector.extract_strided_slice %15 {offsets = [0, 0, 0, 0], sizes = [12, 1, 8, 192], strides = [1, 1, 1, 1]} : vector<12x2x8x192xbf16> to vector<12x1x8x192xbf16>
    %17 = vector.shape_cast %16 : vector<12x1x8x192xbf16> to vector<12x8x192xbf16>
    %18 = vector.extract_strided_slice %15 {offsets = [0, 1, 0, 0], sizes = [12, 1, 8, 192], strides = [1, 1, 1, 1]} : vector<12x2x8x192xbf16> to vector<12x1x8x192xbf16>
    %19 = vector.shape_cast %18 : vector<12x1x8x192xbf16> to vector<12x8x192xbf16>
    %20 = arith.maximumf %17, %19 : vector<12x8x192xbf16>
    %21 = vector.extract_strided_slice %20 {offsets = [0, 0, 0], sizes = [8, 8, 192], strides = [1, 1, 1]} : vector<12x8x192xbf16> to vector<8x8x192xbf16>
    %22 = vector.shape_cast %21 : vector<8x8x192xbf16> to vector<64x192xbf16>
    %c0_11 = arith.constant 0 : index
    %c0_12 = arith.constant 0 : index
    %c0_13 = arith.constant 0 : index
    %23 = vector.load %arg4[%c0_11, %c0_12, %c0_13] : memref<5x192x256xbf16, #tpu.memory_space<vmem>>, vector<1x192x256xbf16>
    %24 = vector.shape_cast %23 : vector<1x192x256xbf16> to vector<192x256xbf16>
    %cst_14 = arith.constant dense<0.000000e+00> : vector<64x256xf32>
    %25 = tpu.matmul %22, %24, %cst_14 {dimension_numbers = #tpu.dot_dimension_numbers<[1], [0], [0], [1], [0, 0, 1, 1], [], []>} : vector<64x192xbf16>, vector<192x256xbf16>, vector<64x256xf32> -> vector<64x256xf32>
    %26 = vector.extract_strided_slice %20 {offsets = [1, 0, 0], sizes = [8, 8, 192], strides = [1, 1, 1]} : vector<12x8x192xbf16> to vector<8x8x192xbf16>
    %27 = vector.shape_cast %26 : vector<8x8x192xbf16> to vector<64x192xbf16>
    %c1_15 = arith.constant 1 : index
    %c0_16 = arith.constant 0 : index
    %c0_17 = arith.constant 0 : index
    %28 = vector.load %arg4[%c1_15, %c0_16, %c0_17] : memref<5x192x256xbf16, #tpu.memory_space<vmem>>, vector<1x192x256xbf16>
    %29 = vector.shape_cast %28 : vector<1x192x256xbf16> to vector<192x256xbf16>
    %cst_18 = arith.constant dense<0.000000e+00> : vector<64x256xf32>
    %30 = tpu.matmul %27, %29, %cst_18 {dimension_numbers = #tpu.dot_dimension_numbers<[1], [0], [0], [1], [0, 0, 1, 1], [], []>} : vector<64x192xbf16>, vector<192x256xbf16>, vector<64x256xf32> -> vector<64x256xf32>
    %31 = arith.addf %25, %30 : vector<64x256xf32>
    %32 = vector.extract_strided_slice %20 {offsets = [2, 0, 0], sizes = [8, 8, 192], strides = [1, 1, 1]} : vector<12x8x192xbf16> to vector<8x8x192xbf16>
    %33 = vector.shape_cast %32 : vector<8x8x192xbf16> to vector<64x192xbf16>
    %c2 = arith.constant 2 : index
    %c0_19 = arith.constant 0 : index
    %c0_20 = arith.constant 0 : index
    %34 = vector.load %arg4[%c2, %c0_19, %c0_20] : memref<5x192x256xbf16, #tpu.memory_space<vmem>>, vector<1x192x256xbf16>
    %35 = vector.shape_cast %34 : vector<1x192x256xbf16> to vector<192x256xbf16>
    %cst_21 = arith.constant dense<0.000000e+00> : vector<64x256xf32>
    %36 = tpu.matmul %33, %35, %cst_21 {dimension_numbers = #tpu.dot_dimension_numbers<[1], [0], [0], [1], [0, 0, 1, 1], [], []>} : vector<64x192xbf16>, vector<192x256xbf16>, vector<64x256xf32> -> vector<64x256xf32>
    %37 = arith.addf %31, %36 : vector<64x256xf32>
    %38 = vector.extract_strided_slice %20 {offsets = [3, 0, 0], sizes = [8, 8, 192], strides = [1, 1, 1]} : vector<12x8x192xbf16> to vector<8x8x192xbf16>
    %39 = vector.shape_cast %38 : vector<8x8x192xbf16> to vector<64x192xbf16>
    %c3 = arith.constant 3 : index
    %c0_22 = arith.constant 0 : index
    %c0_23 = arith.constant 0 : index
    %40 = vector.load %arg4[%c3, %c0_22, %c0_23] : memref<5x192x256xbf16, #tpu.memory_space<vmem>>, vector<1x192x256xbf16>
    %41 = vector.shape_cast %40 : vector<1x192x256xbf16> to vector<192x256xbf16>
    %cst_24 = arith.constant dense<0.000000e+00> : vector<64x256xf32>
    %42 = tpu.matmul %39, %41, %cst_24 {dimension_numbers = #tpu.dot_dimension_numbers<[1], [0], [0], [1], [0, 0, 1, 1], [], []>} : vector<64x192xbf16>, vector<192x256xbf16>, vector<64x256xf32> -> vector<64x256xf32>
    %43 = arith.addf %37, %42 : vector<64x256xf32>
    %44 = vector.extract_strided_slice %20 {offsets = [4, 0, 0], sizes = [8, 8, 192], strides = [1, 1, 1]} : vector<12x8x192xbf16> to vector<8x8x192xbf16>
    %45 = vector.shape_cast %44 : vector<8x8x192xbf16> to vector<64x192xbf16>
    %c4 = arith.constant 4 : index
    %c0_25 = arith.constant 0 : index
    %c0_26 = arith.constant 0 : index
    %46 = vector.load %arg4[%c4, %c0_25, %c0_26] : memref<5x192x256xbf16, #tpu.memory_space<vmem>>, vector<1x192x256xbf16>
    %47 = vector.shape_cast %46 : vector<1x192x256xbf16> to vector<192x256xbf16>
    %cst_27 = arith.constant dense<0.000000e+00> : vector<64x256xf32>
    %48 = tpu.matmul %45, %47, %cst_27 {dimension_numbers = #tpu.dot_dimension_numbers<[1], [0], [0], [1], [0, 0, 1, 1], [], []>} : vector<64x192xbf16>, vector<192x256xbf16>, vector<64x256xf32> -> vector<64x256xf32>
    %49 = arith.addf %43, %48 : vector<64x256xf32>
    %50 = vector.extract_strided_slice %49 {offsets = [0, 0], sizes = [64, 128], strides = [1, 1]} : vector<64x256xf32> to vector<64x128xf32>
    %51 = vector.extract_strided_slice %49 {offsets = [0, 128], sizes = [64, 128], strides = [1, 1]} : vector<64x256xf32> to vector<64x128xf32>
    %52 = arith.maximumf %50, %51 : vector<64x128xf32>
    %c0_28 = arith.constant 0 : index
    %c0_29 = arith.constant 0 : index
    %53 = vector.load %arg5[%c0_28, %c0_29] : memref<1x128xf32, #tpu.memory_space<vmem>>, vector<1x128xf32>
    %54 = vector.broadcast %53 : vector<1x128xf32> to vector<64x128xf32>
    %55 = arith.addf %52, %54 : vector<64x128xf32>
    %cst_30 = arith.constant 0.000000e+00 : f32
    %56 = vector.broadcast %cst_30 : f32 to vector<64x128xf32>
    %57 = arith.maximumf %55, %56 : vector<64x128xf32>
    %58 = arith.truncf %57 : vector<64x128xf32> to vector<64x128xbf16>
    %59 = vector.shape_cast %58 : vector<64x128xbf16> to vector<4x2x8x128xbf16>
    %60 = vector.extract_strided_slice %59 {offsets = [0, 0, 0, 0], sizes = [4, 1, 8, 128], strides = [1, 1, 1, 1]} : vector<4x2x8x128xbf16> to vector<4x1x8x128xbf16>
    %61 = vector.shape_cast %60 : vector<4x1x8x128xbf16> to vector<4x8x128xbf16>
    %62 = vector.extract_strided_slice %59 {offsets = [0, 1, 0, 0], sizes = [4, 1, 8, 128], strides = [1, 1, 1, 1]} : vector<4x2x8x128xbf16> to vector<4x1x8x128xbf16>
    %63 = vector.shape_cast %62 : vector<4x1x8x128xbf16> to vector<4x8x128xbf16>
    %64 = arith.maximumf %61, %63 : vector<4x8x128xbf16>
    %65 = vector.extract_strided_slice %64 {offsets = [0, 0, 0], sizes = [1, 8, 128], strides = [1, 1, 1]} : vector<4x8x128xbf16> to vector<1x8x128xbf16>
    %66 = vector.shape_cast %65 : vector<1x8x128xbf16> to vector<8x128xbf16>
    %67 = vector.extract_strided_slice %64 {offsets = [1, 0, 0], sizes = [1, 8, 128], strides = [1, 1, 1]} : vector<4x8x128xbf16> to vector<1x8x128xbf16>
    %68 = vector.shape_cast %67 : vector<1x8x128xbf16> to vector<8x128xbf16>
    %69 = vector.extract_strided_slice %64 {offsets = [2, 0, 0], sizes = [1, 8, 128], strides = [1, 1, 1]} : vector<4x8x128xbf16> to vector<1x8x128xbf16>
    %70 = vector.shape_cast %69 : vector<1x8x128xbf16> to vector<8x128xbf16>
    %71 = vector.extract_strided_slice %64 {offsets = [3, 0, 0], sizes = [1, 8, 128], strides = [1, 1, 1]} : vector<4x8x128xbf16> to vector<1x8x128xbf16>
    %72 = vector.shape_cast %71 : vector<1x8x128xbf16> to vector<8x128xbf16>
    %73 = tpu.concatenate %66, %68, %70, %72 in 1 : vector<8x128xbf16>, vector<8x128xbf16>, vector<8x128xbf16>, vector<8x128xbf16> -> vector<8x512xbf16>
    %c0_31 = arith.constant 0 : index
    %c0_32 = arith.constant 0 : index
    %74 = vector.load %arg6[%c0_31, %c0_32] : memref<512x128xbf16, #tpu.memory_space<vmem>>, vector<512x128xbf16>
    %cst_33 = arith.constant dense<0.000000e+00> : vector<8x128xf32>
    %75 = tpu.matmul %73, %74, %cst_33 {dimension_numbers = #tpu.dot_dimension_numbers<[1], [0], [0], [1], [0, 0, 1, 1], [], []>} : vector<8x512xbf16>, vector<512x128xbf16>, vector<8x128xf32> -> vector<8x128xf32>
    %c0_34 = arith.constant 0 : index
    %c0_35 = arith.constant 0 : index
    %76 = vector.load %arg7[%c0_34, %c0_35] : memref<1x128xf32, #tpu.memory_space<vmem>>, vector<1x128xf32>
    %77 = vector.broadcast %76 : vector<1x128xf32> to vector<8x128xf32>
    %78 = arith.addf %75, %77 : vector<8x128xf32>
    %cst_36 = arith.constant 0.000000e+00 : f32
    %79 = vector.broadcast %cst_36 : f32 to vector<8x128xf32>
    %80 = arith.maximumf %78, %79 : vector<8x128xf32>
    %81 = arith.truncf %80 : vector<8x128xf32> to vector<8x128xbf16>
    %c0_37 = arith.constant 0 : index
    %c0_38 = arith.constant 0 : index
    %82 = vector.load %arg8[%c0_37, %c0_38] : memref<128x128xbf16, #tpu.memory_space<vmem>>, vector<128x128xbf16>
    %cst_39 = arith.constant dense<0.000000e+00> : vector<8x128xf32>
    %83 = tpu.matmul %81, %82, %cst_39 {dimension_numbers = #tpu.dot_dimension_numbers<[1], [0], [0], [1], [0, 0, 1, 1], [], []>} : vector<8x128xbf16>, vector<128x128xbf16>, vector<8x128xf32> -> vector<8x128xf32>
    %c0_40 = arith.constant 0 : index
    %c0_41 = arith.constant 0 : index
    %84 = vector.load %arg9[%c0_40, %c0_41] : memref<1x128xf32, #tpu.memory_space<vmem>>, vector<1x128xf32>
    %85 = vector.broadcast %84 : vector<1x128xf32> to vector<8x128xf32>
    %86 = arith.addf %83, %85 : vector<8x128xf32>
    %c0_42 = arith.constant 0 : index
    %c0_43 = arith.constant 0 : index
    %87 = vector.load %arg10[%c0_42, %c0_43] : memref<8x128xf32, #tpu.memory_space<vmem>>, vector<8x128xf32>
    tpu.vector_store %arg10[%c0_42, %c0_43], %86 {strides = array<i32>} : memref<8x128xf32, #tpu.memory_space<vmem>>, vector<8x128xf32>,
    return
  }
  func.func @transform_0(%arg0: i32) -> (i32, i32, i32) {
    %c0_i32 = arith.constant 0 : i32
    %c0_i32_0 = arith.constant 0 : i32
    %c0_i32_1 = arith.constant 0 : i32
    return %c0_i32, %arg0, %c0_i32_0 : i32, i32, i32
  }
  func.func @transform_1(%arg0: i32) -> (i32, i32, i32) {
    %c0_i32 = arith.constant 0 : i32
    %c0_i32_0 = arith.constant 0 : i32
    %c0_i32_1 = arith.constant 0 : i32
    %c0_i32_2 = arith.constant 0 : i32
    return %c0_i32, %c0_i32_0, %c0_i32_1 : i32, i32, i32
  }
  func.func @transform_2(%arg0: i32) -> (i32, i32) {
    %c0_i32 = arith.constant 0 : i32
    %c0_i32_0 = arith.constant 0 : i32
    %c0_i32_1 = arith.constant 0 : i32
    return %c0_i32, %c0_i32_0 : i32, i32
  }
  func.func @transform_3(%arg0: i32) -> (i32, i32, i32) {
    %c0_i32 = arith.constant 0 : i32
    %c0_i32_0 = arith.constant 0 : i32
    %c0_i32_1 = arith.constant 0 : i32
    %c0_i32_2 = arith.constant 0 : i32
    return %c0_i32, %c0_i32_0, %c0_i32_1 : i32, i32, i32
  }
  func.func @transform_4(%arg0: i32) -> (i32, i32) {
    %c0_i32 = arith.constant 0 : i32
    %c0_i32_0 = arith.constant 0 : i32
    %c0_i32_1 = arith.constant 0 : i32
    return %c0_i32, %c0_i32_0 : i32, i32
  }
  func.func @transform_5(%arg0: i32) -> (i32, i32) {
    %c0_i32 = arith.constant 0 : i32
    %c0_i32_0 = arith.constant 0 : i32
    %c0_i32_1 = arith.constant 0 : i32
    return %c0_i32, %c0_i32_0 : i32, i32
  }
  func.func @transform_6(%arg0: i32) -> (i32, i32) {
    %c0_i32 = arith.constant 0 : i32
    %c0_i32_0 = arith.constant 0 : i32
    %c0_i32_1 = arith.constant 0 : i32
    return %c0_i32, %c0_i32_0 : i32, i32
  }
  func.func @transform_7(%arg0: i32) -> (i32, i32) {
    %c0_i32 = arith.constant 0 : i32
    %c0_i32_0 = arith.constant 0 : i32
    %c0_i32_1 = arith.constant 0 : i32
    return %c0_i32, %c0_i32_0 : i32, i32
  }
  func.func @transform_8(%arg0: i32) -> (i32, i32) {
    %c0_i32 = arith.constant 0 : i32
    %c0_i32_0 = arith.constant 0 : i32
    %c0_i32_1 = arith.constant 0 : i32
    return %c0_i32, %c0_i32_0 : i32, i32
  }
  func.func @transform_9(%arg0: i32) -> (i32, i32) {
    %c0_i32 = arith.constant 0 : i32
    %c0_i32_0 = arith.constant 0 : i32
    return %arg0, %c0_i32 : i32, i32
  }
}

</mosaic_0001>

<bundles_post_ra>
// kernel: fused_forward.1
= control target key start
LH: loop header
LB: loop body
LE: loop exit
PB: predicated region body
PF: predicated region fallthrough
CT: control target
= control target key end

     0   :  { %vm271_vm0 = vcmask 97280   ;;  %vm308_vm1 = vcmask 1045504   ;;  %vm1251_vm2 = vcmask 523264   ;;  %vm3669_vm3 = vmmov 0   ;;  %s4650_s1 = inlined_call_operand.vmem [shape: bf16[2,140,192], index: 1, kind: input, shape index: {}]   ;;  %s4651_s0 = inlined_call_operand.vmem [shape: bf16[24,8,140], index: 0, kind: input, shape index: {}]   ;;  %s4652_s3 = inlined_call_operand.vmem [shape: bf16[5,192,256], index: 3, kind: input, shape index: {}]   ;;  %s4653_s2 = inlined_call_operand.vmem [shape: f32[1,192], index: 2, kind: input, shape index: {}]   ;;  %s4654_s5 = inlined_call_operand.vmem [shape: bf16[512,128], index: 5, kind: input, shape index: {}]   ;;  %s4655_s4 = inlined_call_operand.vmem [shape: f32[1,128], index: 4, kind: input, shape index: {}]   ;;  %s4656_s7 = inlined_call_operand.vmem [shape: bf16[128,128], index: 7, kind: input, shape index: {}]   ;;  %s4657_s6 = inlined_call_operand.vmem [shape: f32[1,128], index: 6, kind: input, shape index: {}]   ;;  %s4658_s8 = inlined_call_operand.vmem [shape: f32[1,128], index: 8, kind: input, shape index: {}]   ;;  %s4659_s9 = inlined_call_operand.vmem [shape: f32[8,128], index: 9, kind: output, shape index: {}]  }
   0x1   :  { %v3358_v0 = vld [vmem:[%s4650_s1 + $0x74] ss:$8 sps:$4 sm:$0xff]   ;;  %v3360_v1 = vld [vmem:[%s4650_s1 + $0x104] ss:$8 sps:$4 sm:$0xff]   ;;  %v3362_v2 = vld [vmem:[%s4650_s1 + $0x70] ss:$8 sps:$4 sm:$0xff]  }
   0x2   :  { %315 = vmatprep.subr.bf16.mxu0 %v3358_v0  ;;  %v3363_v3 = vld [vmem:[%s4650_s1 + $0x100] ss:$8 sps:$4 sm:$0xff]   ;;  %581 = vmatprep.subr.bf16.mxu1 %v3360_v1  ;;  %v3364_v4 = vld [vmem:[%s4650_s1 + $0x64] ss:$8 sps:$4 sm:$0xff]   ;;  %v3366_v5 = vld [vmem:[%s4650_s1 + $0xf4] ss:$8 sps:$4 sm:$0xff]  }
   0x3   :  { %316 = vmatpush1.bf16.msra.mxu0 %v3362_v2  ;;  %582 = vmatpush1.bf16.msra.mxu1 %v3363_v3  ;;  %v3368_v6 = vld [vmem:[%s4650_s1 + $0x60] ss:$8 sps:$4 sm:$0xff]   ;;  %v3369_v7 = vld [vmem:[%s4650_s1 + $0xf0] ss:$8 sps:$4 sm:$0xff]   ;;  %v3370_v8 = vld [vmem:[%s4650_s1 + $0x54] ss:$8 sps:$4 sm:$0xff]  }
   0x4   :  { %317 = vmatprep.subr.bf16.mxu0 %v3364_v4  ;;  %583 = vmatprep.subr.bf16.mxu1 %v3366_v5  ;;  %v3372_v9 = vld [vmem:[%s4650_s1 + $0xe4] ss:$8 sps:$4 sm:$0xff]   ;;  %v3374_v10 = vld [vmem:[%s4650_s1 + $0x50] ss:$8 sps:$4 sm:$0xff]   ;;  %v3375_v11 = vld [vmem:[%s4650_s1 + $0xe0] ss:$8 sps:$4 sm:$0xff]  }
   0x5   :  { %v3376_v12 = vld [vmem:[%s4650_s1 + $0x44] ss:$8 sps:$4 sm:$0xff]   ;;  %v3378_v13 = vld [vmem:[%s4650_s1 + $0xd4] ss:$8 sps:$4 sm:$0xff]   ;;  %v3380_v14 = vld [vmem:[%s4650_s1 + $0x40] ss:$8 sps:$4 sm:$0xff]  }
   0x6   :  { %v3381_v15 = vld [vmem:[%s4650_s1 + $0xd0] ss:$8 sps:$4 sm:$0xff]   ;;  %v3382_v16 = vld [vmem:[%s4650_s1 + $0x34] ss:$8 sps:$4 sm:$0xff]   ;;  %v3384_v17 = vld [vmem:[%s4650_s1 + $0xc4] ss:$8 sps:$4 sm:$0xff]  }
   0x7   :  { %318 = vmatpush1.bf16.msra.mxu0 %v3368_v6  ;;  %584 = vmatpush1.bf16.msra.mxu1 %v3369_v7  ;;  %v3386_v18 = vld [vmem:[%s4650_s1 + $0x30] ss:$8 sps:$4 sm:$0xff]   ;;  %v3387_v19 = vld [vmem:[%s4650_s1 + $0xc0] ss:$8 sps:$4 sm:$0xff]   ;;  %v3388_v20 = vld [vmem:[%s4650_s1 + $0x24] ss:$8 sps:$4 sm:$0xff]  }
   0x8   :  { %319 = vmatprep.subr.bf16.mxu0 %v3370_v8  ;;  %585 = vmatprep.subr.bf16.mxu1 %v3372_v9  ;;  %v3390_v21 = vld [vmem:[%s4650_s1 + $0xb4] ss:$8 sps:$4 sm:$0xff]   ;;  %v3392_v22 = vld [vmem:[%s4650_s1 + $0x20] ss:$8 sps:$4 sm:$0xff]   ;;  %v3393_v23 = vld [vmem:[%s4650_s1 + $0xb0] ss:$8 sps:$4 sm:$0xff]  }
   0x9   :  { %v3394_v24 = vld [vmem:[%s4650_s1 + $0x14] ss:$8 sps:$4 sm:$0xff]   ;;  %v3396_v25 = vld [vmem:[%s4650_s1 + $0xa4] ss:$8 sps:$4 sm:$0xff]   ;;  %v3398_v26 = vld [vmem:[%s4650_s1 + $0x10] ss:$8 sps:$4 sm:$0xff]  }
   0xa   :  { %v3399_v27 = vld [vmem:[%s4650_s1 + $0xa0] ss:$8 sps:$4 sm:$0xff]   ;;  %v3400_v28 = vld [vmem:[%s4650_s1 + $0x4] ss:$8 sps:$4 sm:$0xff]   ;;  %v3402_v29 = vld [vmem:[%s4650_s1 + $0x94] ss:$8 sps:$4 sm:$0xff]  }
   0xb   :  { %320 = vmatpush1.bf16.msra.mxu0 %v3374_v10  ;;  %586 = vmatpush1.bf16.msra.mxu1 %v3375_v11  ;;  %v3414_v30 = vld [vmem:[%s4651_s0 + $0x4] ss:$8 sps:$4 sm:$0xff]   ;;  %v3404_v31 = vld [vmem:[%s4650_s1] ss:$8 sps:$4 sm:$0xff]   ;;  %v3405_v32 = vld [vmem:[%s4650_s1 + $0x90] ss:$8 sps:$4 sm:$0xff]  }
   0xc   :  { %321 = vmatprep.subr.bf16.mxu0 %v3376_v12  ;;  %587 = vmatprep.subr.bf16.mxu1 %v3378_v13  ;;  %v3406_v33 = vld [vmem:[%s4650_s1 + $0x84] ss:$8 sps:$4 sm:$0x3f]   ;;  %v3408_v34 = vld [vmem:[%s4650_s1 + $0x114] ss:$8 sps:$4 sm:$0x3f]  }
   0xd   :  { %2857 = vmatprep.mubr.msk.bf16.mxu0 %vm271_vm0, %v3414_v30  ;;  %2906 = vmatprep.mubr.msk.bf16.mxu1 %vm271_vm0, %v3414_v30  ;;  %v3410_v35 = vld [vmem:[%s4650_s1 + $0x80] ss:$8 sps:$4 sm:$0x3f]   ;;  %v3411_v36 = vld [vmem:[%s4650_s1 + $0x110] ss:$8 sps:$4 sm:$0x3f]  }
   0xe   :  { %v310_v37 = vsel %vm308_vm1, %v3410_v35, 0  ;;  %v576_v38 = vsel %vm308_vm1, %v3411_v36, 0  ;;  %v3412_v39 = vld [vmem:[%s4651_s0] ss:$8 sps:$4 sm:$0xff]   ;;  %v3415_v40 = vld [vmem:[%s4651_s0 + $0x14] ss:$8 sps:$4 sm:$0xff]  }
   0xf   :  { %322 = vmatpush1.bf16.msra.mxu0 %v3380_v14  ;;  %588 = vmatpush1.bf16.msra.mxu1 %v3381_v15  ;;  %v3445_v41 = vld [vmem:[%s4652_s3 + $0x130] ss:$8 sps:$4 sm:$0xff]   ;;  %v3447_v42 = vld [vmem:[%s4652_s3 + $0x134] ss:$8 sps:$4 sm:$0xff]   ;;  %v3453_v43 = vld [vmem:[%s4652_s3 + $0x124] ss:$8 sps:$4 sm:$0xff]  }
  0x10   :  { %323 = vmatprep.subr.bf16.mxu0 %v3382_v16  ;;  %589 = vmatprep.subr.bf16.mxu1 %v3384_v17  ;;  %v3417_v44 = vld [vmem:[%s4651_s0 + $0x10] ss:$8 sps:$4 sm:$0xff]   ;;  %v3418_v45 = vld [vmem:[%s4651_s0 + $0x24] ss:$8 sps:$4 sm:$0xff]   ;;  %v3451_v46 = vld [vmem:[%s4652_s3 + $0x120] ss:$8 sps:$4 sm:$0xff]  }
  0x11   :  { %v3456_v47 = vld [vmem:[%s4652_s3 + $0x114] ss:$8 sps:$4 sm:$0xff]   ;;  %v3463_v48 = vld [vmem:[%s4652_s3 + $0x70] ss:$8 sps:$4 sm:$0xff]   ;;  %v3468_v51 = vld [vmem:[%s4652_s3 + $0x64] ss:$8 sps:$4 sm:$0xff]  }
  0x12   :  { %v3465_v49 = vld [vmem:[%s4652_s3 + $0x74] ss:$8 sps:$4 sm:$0xff]   ;;  %v3454_v50 = vld [vmem:[%s4652_s3 + $0x110] ss:$8 sps:$4 sm:$0xff]   ;;  %v3459_v52 = vld [vmem:[%s4652_s3 + $0x104] ss:$8 sps:$4 sm:$0xff]  }
  0x13   :  { %324 = vmatpush1.bf16.msra.mxu0 %v3386_v18  ;;  %590 = vmatpush1.bf16.msra.mxu1 %v3387_v19  ;;  %v3420_v53 = vld [vmem:[%s4651_s0 + $0x20] ss:$8 sps:$4 sm:$0xff]   ;;  %v3421_v54 = vld [vmem:[%s4651_s0 + $0x34] ss:$8 sps:$4 sm:$0xff]   ;;  %v3460_v59 = vld [vmem:[%s4652_s3 + $0xf0] ss:$8 sps:$4 sm:$0xff]  }
  0x14   :  { %325 = vmatprep.subr.bf16.mxu0 %v3388_v20  ;;  %591 = vmatprep.subr.bf16.mxu1 %v3390_v21  ;;  %v3457_v55 = vld [vmem:[%s4652_s3 + $0x100] ss:$8 sps:$4 sm:$0xff]   ;;  %v3462_v57 = vld [vmem:[%s4652_s3 + $0xf4] ss:$8 sps:$4 sm:$0xff]   ;;  %v3472_v60 = vld [vmem:[%s4652_s3 + $0x50] ss:$8 sps:$4 sm:$0xff]  }
  0x15   :  { %v3466_v56 = vld [vmem:[%s4652_s3 + $0x60] ss:$8 sps:$4 sm:$0xff]   ;;  %v3474_v58 = vld [vmem:[%s4652_s3 + $0x54] ss:$8 sps:$4 sm:$0xff]   ;;  %v3471_v61 = vld [vmem:[%s4652_s3 + $0xe4] ss:$8 sps:$4 sm:$0xff]  }
  0x16   :  { %v3477_v62 = vld [vmem:[%s4652_s3 + $0x44] ss:$8 sps:$4 sm:$0xff]   ;;  %v3423_v63 = vld [vmem:[%s4651_s0 + $0x30] ss:$8 sps:$4 sm:$0xff]   ;;  %v3469_v1 = vld [vmem:[%s4652_s3 + $0xe0] ss:$8 sps:$4 sm:$0xff]  }
  0x17   :  { %326 = vmatpush1.bf16.msra.mxu0 %v3392_v22  ;;  %592 = vmatpush1.bf16.msra.mxu1 %v3393_v23  ;;  %v3424_v0 = vld [vmem:[%s4651_s0 + $0x44] ss:$8 sps:$4 sm:$0xff]   ;;  %v3475_v2 = vld [vmem:[%s4652_s3 + $0x40] ss:$8 sps:$4 sm:$0xff]   ;;  %v3480_v3 = vld [vmem:[%s4652_s3 + $0xd4] ss:$8 sps:$4 sm:$0xff]  }
  0x18   :  { %327 = vmatprep.subr.bf16.mxu0 %v3394_v24  ;;  %593 = vmatprep.subr.bf16.mxu1 %v3396_v25  ;;  %v3483_v4 = vld [vmem:[%s4652_s3 + $0x34] ss:$8 sps:$4 sm:$0xff]   ;;  %v3478_v5 = vld [vmem:[%s4652_s3 + $0xd0] ss:$8 sps:$4 sm:$0xff]   ;;  %v3426_v7 = vld [vmem:[%s4651_s0 + $0x40] ss:$8 sps:$4 sm:$0xff]  }
  0x19   :  { %v3481_v6 = vld [vmem:[%s4652_s3 + $0x30] ss:$8 sps:$4 sm:$0xff]   ;;  %v3427_v8 = vld [vmem:[%s4651_s0 + $0x54] ss:$8 sps:$4 sm:$0xff]   ;;  %v3430_v10 = vld [vmem:[%s4651_s0 + $0x64] ss:$8 sps:$4 sm:$0xff]  }
  0x1a   :  { %v3429_v9 = vld [vmem:[%s4651_s0 + $0x50] ss:$8 sps:$4 sm:$0xff]   ;;  %v3432_v11 = vld [vmem:[%s4651_s0 + $0x60] ss:$8 sps:$4 sm:$0xff]   ;;  %v3433_v12 = vld [vmem:[%s4651_s0 + $0x74] ss:$8 sps:$4 sm:$0xff]  }
  0x1b   :  { %328 = vmatpush1.bf16.msra.mxu0 %v3398_v26  ;;  %594 = vmatpush1.bf16.msra.mxu1 %v3399_v27  ;;  %v3435_v13 = vld [vmem:[%s4651_s0 + $0x70] ss:$8 sps:$4 sm:$0xff]   ;;  %v3436_v14 = vld [vmem:[%s4651_s0 + $0x84] ss:$8 sps:$4 sm:$0xff]   ;;  %v3438_v15 = vld [vmem:[%s4651_s0 + $0x80] ss:$8 sps:$4 sm:$0xff]  }
  0x1c   :  { %329 = vmatprep.subr.bf16.mxu0 %v3400_v28  ;;  %595 = vmatprep.subr.bf16.mxu1 %v3402_v29  ;;  %v3439_v16 = vld [vmem:[%s4651_s0 + $0x94] ss:$8 sps:$4 sm:$0xff]   ;;  %v3486_v17 = vld [vmem:[%s4652_s3 + $0x24] ss:$8 sps:$4 sm:$0xff]   ;;  %v3484_v18 = vld [vmem:[%s4652_s3 + $0x20] ss:$8 sps:$4 sm:$0xff]  }
  0x1d   :  { %v3492_v19 = vld [vmem:[%s4652_s3 + $0x14] ss:$8 sps:$4 sm:$0xff]   ;;  %v3490_v20 = vld [vmem:[%s4652_s3 + $0x10] ss:$8 sps:$4 sm:$0xff]   ;;  %v3442_v22 = vld [vmem:[%s4651_s0 + $0xa4] ss:$8 sps:$4 sm:$0xff]  }
  0x1e   :  { %v3441_v21 = vld [vmem:[%s4651_s0 + $0x90] ss:$8 sps:$4 sm:$0xff]   ;;  %v3495_v23 = vld [vmem:[%s4652_s3 + $0x4] ss:$8 sps:$4 sm:$0xff]   ;;  %v3493_v24 = vld [vmem:[%s4652_s3] ss:$8 sps:$4 sm:$0xff]  }
  0x1f   :  { %330 = vmatpush1.bf16.msra.mxu0 %v3404_v31  ;;  %596 = vmatpush1.bf16.msra.mxu1 %v3405_v32  ;;  %v3487_v25 = vld [vmem:[%s4652_s3 + $0xc0] ss:$8 sps:$4 sm:$0xff]   ;;  %v3489_v26 = vld [vmem:[%s4652_s3 + $0xc4] ss:$8 sps:$4 sm:$0xff]   ;;  %v3501_v27 = vld [vmem:[%s4652_s3 + $0xb4] ss:$8 sps:$4 sm:$0xff]  }
  0x20   :  { %2856 = vmatprep.subr.msk.bf16.mxu0 %vm308_vm1, %v3406_v33  ;;  %2905 = vmatprep.subr.msk.bf16.mxu1 %vm308_vm1, %v3408_v34  ;;  %v3499_v28 = vld [vmem:[%s4652_s3 + $0xb0] ss:$8 sps:$4 sm:$0xff]   ;;  %v3444_v29 = vld [vmem:[%s4651_s0 + $0xa0] ss:$8 sps:$4 sm:$0xff]   ;;  %v3448_v30 = vld [vmem:[%s4651_s0 + $0xb4] ss:$8 sps:$4 sm:$0xff]  }
  0x21   :  { %v3504_v31 = vld [vmem:[%s4652_s3 + $0xa4] ss:$8 sps:$4 sm:$0xff]   ;;  %v3502_v32 = vld [vmem:[%s4652_s3 + $0xa0] ss:$8 sps:$4 sm:$0xff]   ;;  %v3496_v33 = vld [vmem:[%s4652_s3 + $0x170] ss:$8 sps:$4 sm:$0xff]  }
  0x22   :  { %v3498_v34 = vld [vmem:[%s4652_s3 + $0x174] ss:$8 sps:$4 sm:$0xff]   ;;  %v3508_v36 = vld [vmem:[%s4652_s3 + $0x90] ss:$8 sps:$4 sm:$0xff]  }
  0x23   :  { %346 = vmatpush2.bf16.msra.mxu0 %v310_v37  ;;  %612 = vmatpush2.bf16.msra.mxu1 %v576_v38  ;;  %v3510_v35 = vld [vmem:[%s4652_s3 + $0x94] ss:$8 sps:$4 sm:$0xff]   ;;  %v3450_v37 = vld [vmem:[%s4651_s0 + $0xb0] ss:$8 sps:$4 sm:$0xff]   ;;  %v3507_v38 = vld [vmem:[%s4652_s3 + $0x164] ss:$8 sps:$4 sm:$0xff]  }
  0x24   :  { %1264 = vmatprep.subr.bf16.mxu0 %v3447_v42  ;;  %1484 = vmatprep.subr.bf16.mxu1 %v3465_v49  ;;  %v3516_v42 = vld [vmem:[%s4652_s3 + $0x154] ss:$8 sps:$4 sm:$0xff]  }
  0x26   :  { %348 = vmatmul.mubr.bf16.vlgmr.msra.gmra.mxu0 %v3412_v39  ;;  %614 = vmatmul.mubr.bf16.vlgmr.msra.gmra.mxu1 %v3412_v39  ;;  %v3513_v39 = vld [vmem:[%s4652_s3 + $0x84] ss:$8 sps:$4 sm:$0xff]  }
  0x27   :  { %2858 = vmatprep.mubr.msk.bf16.mxu0 %vm271_vm0, %v3415_v40  ;;  %2907 = vmatprep.mubr.msk.bf16.mxu1 %vm271_vm0, %v3415_v40  ;;  %v3505_v40 = vld [vmem:[%s4652_s3 + $0x160] ss:$8 sps:$4 sm:$0xff]  }
  0x28   :  { %1265 = vmatpush1.bf16.msra.mxu0 %v3445_v41  ;;  %1485 = vmatpush1.bf16.msra.mxu1 %v3463_v48  ;;  %v3511_v41 = vld [vmem:[%s4652_s3 + $0x80] ss:$8 sps:$4 sm:$0xff]  }
  0x29   :  { %1266 = vmatprep.subr.bf16.mxu0 %v3453_v43  ;;  %1486 = vmatprep.subr.bf16.mxu1 %v3468_v51  ;;  %v3514_v43 = vld [vmem:[%s4652_s3 + $0x150] ss:$8 sps:$4 sm:$0xff]  }
  0x2c   :  { %1267 = vmatpush1.bf16.msra.mxu0 %v3451_v46  ;;  %1487 = vmatpush1.bf16.msra.mxu1 %v3466_v56  ;;  %v3522_v46 = vld [vmem:[%s4652_s3 + $0x2b4] ss:$8 sps:$4 sm:$0xff]  }
  0x2d   :  { %1268 = vmatprep.subr.bf16.mxu0 %v3456_v47  ;;  %1488 = vmatprep.subr.bf16.mxu1 %v3474_v58  ;;  %v3528_v47 = vld [vmem:[%s4652_s3 + $0x1f4] ss:$8 sps:$4 sm:$0xff]  }
  0x2e   :  { %358 = vmatmul.mubr.bf16.gmra.mxu0 %v3417_v44  ;;  %624 = vmatmul.mubr.bf16.gmra.mxu1 %v3417_v44  ;;  %v3519_v44 = vld [vmem:[%s4652_s3 + $0x144] ss:$8 sps:$4 sm:$0xff]  }
  0x2f   :  { %2859 = vmatprep.mubr.msk.bf16.mxu0 %vm271_vm0, %v3418_v45  ;;  %2908 = vmatprep.mubr.msk.bf16.mxu1 %vm271_vm0, %v3418_v45  ;;  %v3517_v45 = vld [vmem:[%s4652_s3 + $0x140] ss:$8 sps:$4 sm:$0xff]  }
  0x30   :  { %1269 = vmatpush1.bf16.msra.mxu0 %v3454_v50  ;;  %1489 = vmatpush1.bf16.msra.mxu1 %v3472_v60  ;;  %v784_v50 = vlaneseq }
  0x31   :  { %1270 = vmatprep.subr.bf16.mxu0 %v3459_v52  ;;  %1490 = vmatprep.subr.bf16.mxu1 %v3477_v62 }
  0x34   :  { %1271 = vmatpush1.bf16.msra.mxu0 %v3457_v55  ;;  %1491 = vmatpush1.bf16.msra.mxu1 %v3475_v2 }
  0x35   :  { %1272 = vmatprep.subr.bf16.mxu0 %v3462_v57  ;;  %1492 = vmatprep.subr.bf16.mxu1 %v3483_v4 }
  0x36   :  { %368 = vmatmul.mubr.bf16.gmra.mxu0 %v3420_v53  ;;  %634 = vmatmul.mubr.bf16.gmra.mxu1 %v3420_v53  ;;  %v785_v53 = vshrl.u32 %v784_v50, 7 }
  0x37   :  { %2860 = vmatprep.mubr.msk.bf16.mxu0 %vm271_vm0, %v3421_v54  ;;  %2909 = vmatprep.mubr.msk.bf16.mxu1 %vm271_vm0, %v3421_v54 }
  0x38   :  { %1273 = vmatpush1.bf16.msra.mxu0 %v3460_v59  ;;  %1493 = vmatpush1.bf16.msra.mxu1 %v3481_v6  ;;  %v790_v56 = vsub.s32 1, %v785_v53  ;;  %v786_v59 = vsub.s32 0, %v785_v53 }
  0x39   :  { %1274 = vmatprep.subr.bf16.mxu0 %v3471_v61  ;;  %1494 = vmatprep.subr.bf16.mxu1 %v3486_v17 }
  0x3c   :  { %1275 = vmatpush1.bf16.msra.mxu0 %v3469_v1  ;;  %1495 = vmatpush1.bf16.msra.mxu1 %v3484_v18 }
  0x3d   :  { %1276 = vmatprep.subr.bf16.mxu0 %v3480_v3  ;;  %1496 = vmatprep.subr.bf16.mxu1 %v3492_v19 }
  0x3e   :  { %378 = vmatmul.mubr.bf16.gmra.mxu0 %v3423_v63  ;;  %644 = vmatmul.mubr.bf16.gmra.mxu1 %v3423_v63  ;;  %v782_v63 = vld [vmem:[%s4653_s2] sm:$0x3] }
  0x3f   :  { %2861 = vmatprep.mubr.msk.bf16.mxu0 %vm271_vm0, %v3424_v0  ;;  %2910 = vmatprep.mubr.msk.bf16.mxu1 %vm271_vm0, %v3424_v0  ;;  %v4077_v1 = vrot.slane %v782_v63, %v790_v56 }
  0x40   :  { %1277 = vmatpush1.bf16.msra.mxu0 %v3478_v5  ;;  %1497 = vmatpush1.bf16.msra.mxu1 %v3490_v20 }
  0x41   :  { %1498 = vmatprep.subr.bf16.mxu1 %v3495_v23  ;;  %1278 = vmatprep.subr.bf16.mxu0 %v3489_v26 }
  0x44   :  { %1499 = vmatpush1.bf16.msra.mxu1 %v3493_v24  ;;  %1279 = vmatpush1.bf16.msra.mxu0 %v3487_v25 }
  0x45   :  { %1508 = vmatprep.subr.bf16.mxu1 %v3501_v27  ;;  %1288 = vmatprep.subr.bf16.mxu0 %v3498_v34 }
  0x46   :  { %388 = vmatmul.mubr.bf16.gmra.mxu0 %v3426_v7  ;;  %654 = vmatmul.mubr.bf16.gmra.mxu1 %v3426_v7 }
  0x47   :  { %2862 = vmatprep.mubr.msk.bf16.mxu0 %vm271_vm0, %v3427_v8  ;;  %2911 = vmatprep.mubr.msk.bf16.mxu1 %vm271_vm0, %v3427_v8  ;;  %v4079_v8 = vrot.slane %v782_v63, %v786_v59 }
  0x48   :  { %1509 = vmatpush2.bf16.msra.mxu1 %v3499_v28  ;;  %1289 = vmatpush2.bf16.msra.mxu0 %v3496_v33 }
  0x49   :  { %1510 = vmatprep.subr.bf16.mxu1 %v3504_v31  ;;  %1290 = vmatprep.subr.bf16.mxu0 %v3507_v38 }
  0x4c   :  { %1511 = vmatpush2.bf16.msra.mxu1 %v3502_v32  ;;  %1291 = vmatpush2.bf16.msra.mxu0 %v3505_v40 }
  0x4d   :  { %1512 = vmatprep.subr.bf16.mxu1 %v3510_v35  ;;  %1292 = vmatprep.subr.bf16.mxu0 %v3516_v42 }
  0x4e   :  { %398 = vmatmul.mubr.bf16.gmra.mxu0 %v3429_v9  ;;  %664 = vmatmul.mubr.bf16.gmra.mxu1 %v3429_v9 }
  0x4f   :  { %2863 = vmatprep.mubr.msk.bf16.mxu0 %vm271_vm0, %v3430_v10  ;;  %2912 = vmatprep.mubr.msk.bf16.mxu1 %vm271_vm0, %v3430_v10 }
  0x50   :  { %1513 = vmatpush2.bf16.msra.mxu1 %v3508_v36  ;;  %1293 = vmatpush2.bf16.msra.mxu0 %v3514_v43 }
  0x51   :  { %1514 = vmatprep.subr.bf16.mxu1 %v3513_v39  ;;  %1294 = vmatprep.subr.bf16.mxu0 %v3519_v44 }
  0x54   :  { %1515 = vmatpush2.bf16.msra.mxu1 %v3511_v41  ;;  %1295 = vmatpush2.bf16.msra.mxu0 %v3517_v45 }
  0x55   :  { %1954 = vmatprep.subr.bf16.mxu1 %v3522_v46  ;;  %1711 = vmatprep.subr.bf16.mxu0 %v3528_v47 }
  0x56   :  { %408 = vmatmul.mubr.bf16.gmra.mxu0 %v3432_v11  ;;  %674 = vmatmul.mubr.bf16.gmra.mxu1 %v3432_v11 }
  0x57   :  { %2864 = vmatprep.mubr.msk.bf16.mxu0 %vm271_vm0, %v3433_v12  ;;  %2913 = vmatprep.mubr.msk.bf16.mxu1 %vm271_vm0, %v3433_v12 }
  0x5e   :  { %418 = vmatmul.mubr.bf16.gmra.mxu0 %v3435_v13  ;;  %684 = vmatmul.mubr.bf16.gmra.mxu1 %v3435_v13 }
  0x5f   :  { %2865 = vmatprep.mubr.msk.bf16.mxu0 %vm271_vm0, %v3436_v14  ;;  %2914 = vmatprep.mubr.msk.bf16.mxu1 %vm271_vm0, %v3436_v14 }
  0x66   :  { %428 = vmatmul.mubr.bf16.gmra.mxu0 %v3438_v15  ;;  %694 = vmatmul.mubr.bf16.gmra.mxu1 %v3438_v15 }
  0x67   :  { %2866 = vmatprep.mubr.msk.bf16.mxu0 %vm271_vm0, %v3439_v16  ;;  %2915 = vmatprep.mubr.msk.bf16.mxu1 %vm271_vm0, %v3439_v16 }
  0x6e   :  { %438 = vmatmul.mubr.bf16.gmra.mxu0 %v3441_v21  ;;  %704 = vmatmul.mubr.bf16.gmra.mxu1 %v3441_v21 }
  0x6f   :  { %2867 = vmatprep.mubr.msk.bf16.mxu0 %vm271_vm0, %v3442_v22  ;;  %2916 = vmatprep.mubr.msk.bf16.mxu1 %vm271_vm0, %v3442_v22 }
  0x76   :  { %448 = vmatmul.mubr.bf16.gmra.mxu0 %v3444_v29  ;;  %714 = vmatmul.mubr.bf16.gmra.mxu1 %v3444_v29 }
  0x77   :  { %2868 = vmatprep.mubr.msk.bf16.mxu0 %vm271_vm0, %v3448_v30  ;;  %2917 = vmatprep.mubr.msk.bf16.mxu1 %vm271_vm0, %v3448_v30 }
  0x7e   :  { %458 = vmatmul.mubr.bf16.gmra.mxu0 %v3450_v37  ;;  %724 = vmatmul.mubr.bf16.gmra.mxu1 %v3450_v37 }
  0xe6   :  { %v349_v48 = vpop.f32.mrf.mxu0  ;;  %v615_v49 = vpop.f32.mrf.mxu1 }
  0xe7   :  { %v734_v7 = vmax.f32 %v349_v48, %v615_v49 }
  0xe8   :  { %v351_v51 = vpop.f32.mrf.mxu0  ;;  %v617_v52 = vpop.f32.mrf.mxu1 }
  0xe9   :  { %v735_v0 = vmax.f32 %v351_v51, %v617_v52  ;;  %v794_v21 = vadd.f32 %v4079_v8, %v734_v7 }
  0xea   :  { %v353_v54 = vpop.f32.mrf.mxu0  ;;  %v619_v55 = vpop.f32.mrf.mxu1 }
  0xeb   :  { %v736_v2 = vmax.f32 %v353_v54, %v619_v55  ;;  %v795_v14 = vadd.f32 %v4077_v1, %v735_v0  ;;  %v842_v36 = vmax.f32 %v794_v21, 0.0 }
  0xec   :  { %v355_v57 = vpop.f32.mrf.mxu0  ;;  %v621_v58 = vpop.f32.mrf.mxu1 }
  0xed   :  { %v737_v60 = vmax.f32 %v355_v57, %v621_v58  ;;  %v796_v15 = vadd.f32 %v4079_v8, %v736_v2  ;;  %v843_v27 = vmax.f32 %v795_v14, 0.0 }
  0xee   :  { %v359_v61 = vpop.f32.mrf.mxu0  ;;  %v625_v62 = vpop.f32.mrf.mxu1 }
  0xef   :  { %v738_v5 = vmax.f32 %v359_v61, %v625_v62  ;;  %v797_v9 = vadd.f32 %v4077_v1, %v737_v60  ;;  %v844_v28 = vmax.f32 %v796_v15, 0.0  ;;  %v3251_v44 = vpack.c.bf16 %v843_v27, %v842_v36  ;;  %v3520_v61 = vld [vmem:[%s4652_s3 + $0x2b0] ss:$8 sps:$4 sm:$0xff]  }
  0xf0   :  { %v361_v3 = vpop.f32.mrf.mxu0  ;;  %v627_v4 = vpop.f32.mrf.mxu1 }
  0xf1   :  { %v739_v6 = vmax.f32 %v361_v3, %v627_v4  ;;  %v798_v18 = vadd.f32 %v4079_v8, %v738_v5  ;;  %v845_v22 = vmax.f32 %v797_v9, 0.0  ;;  %v3525_v3 = vld [vmem:[%s4652_s3 + $0x2a4] ss:$8 sps:$4 sm:$0xff]  }
  0xf2   :  { %v363_v10 = vpop.f32.mrf.mxu0  ;;  %v629_v11 = vpop.f32.mrf.mxu1 }
  0xf3   :  { %v799_v12 = vadd.f32 %v4077_v1, %v739_v6  ;;  %v740_v13 = vmax.f32 %v363_v10, %v629_v11  ;;  %v846_v32 = vmax.f32 %v798_v18, 0.0  ;;  %v3252_v37 = vpack.c.bf16 %v845_v22, %v844_v28  ;;  %v3531_v18 = vld [vmem:[%s4652_s3 + $0x294] ss:$8 sps:$4 sm:$0xff]   ;;  %v3526_v28 = vld [vmem:[%s4652_s3 + $0x1f0] ss:$8 sps:$4 sm:$0xff]  }
  0xf4   :  { %v365_v16 = vpop.f32.mrf.mxu0  ;;  %v631_v17 = vpop.f32.mrf.mxu1 }
  0xf5   :  { %v800_v19 = vadd.f32 %v4079_v8, %v740_v13  ;;  %v741_v20 = vmax.f32 %v365_v16, %v631_v17  ;;  %v847_v25 = vmax.f32 %v799_v12, 0.0  ;;  %v1034_v51 = vmax.bf16 %v3252_v37, %v3251_v44  ;;  %v3523_v13 = vld [vmem:[%s4652_s3 + $0x2a0] ss:$8 sps:$4 sm:$0xff]  }
  0xf6   :  { %v369_v23 = vpop.f32.mrf.mxu0  ;;  %v635_v24 = vpop.f32.mrf.mxu1 }
  0xf7   :  { %v801_v26 = vadd.f32 %v4077_v1, %v741_v20  ;;  %v742_v29 = vmax.f32 %v369_v23, %v635_v24  ;;  %v848_v33 = vmax.f32 %v800_v19, 0.0  ;;  %v3253_v40 = vpack.c.bf16 %v847_v25, %v846_v32 }
  0xf8   :  { %v371_v30 = vpop.f32.mrf.mxu0  ;;  %v637_v31 = vpop.f32.mrf.mxu1 }
  0xf9   :  { %v849_v34 = vmax.f32 %v801_v26, 0.0  ;;  %v743_v35 = vmax.f32 %v371_v30, %v637_v31  ;;  %v802_v45 = vadd.f32 %v4079_v8, %v742_v29  ;;  %v3529_v29 = vld [vmem:[%s4652_s3 + $0x290] ss:$8 sps:$4 sm:$0xff]   ;;  %v3534_v30 = vld [vmem:[%s4652_s3 + $0x1e4] ss:$8 sps:$4 sm:$0xff]  }
  0xfa   :  { %v373_v38 = vpop.f32.mrf.mxu0  ;;  %v639_v39 = vpop.f32.mrf.mxu1 }
  0xfb   :  { %v3254_v41 = vpack.c.bf16 %v849_v34, %v848_v33  ;;  %v803_v42 = vadd.f32 %v4077_v1, %v743_v35  ;;  %v744_v43 = vmax.f32 %v373_v38, %v639_v39  ;;  %v850_v56 = vmax.f32 %v802_v45, 0.0  ;;  %v3537_v35 = vld [vmem:[%s4652_s3 + $0x284] ss:$8 sps:$4 sm:$0xff]   ;;  %v3532_v45 = vld [vmem:[%s4652_s3 + $0x1e0] ss:$8 sps:$4 sm:$0xff]  }
  0xfc   :  { %v375_v46 = vpop.f32.mrf.mxu0  ;;  %v641_v47 = vpop.f32.mrf.mxu1 }
  0xfd   :  { %v4091_v48 = vmax.bf16 %v3254_v41, %v3253_v40  ;;  %v804_v49 = vadd.f32 %v4079_v8, %v744_v43  ;;  %v745_v50 = vmax.f32 %v375_v46, %v641_v47  ;;  %v851_v54 = vmax.f32 %v803_v42, 0.0  ;;  %v3535_v46 = vld [vmem:[%s4652_s3 + $0x280] ss:$8 sps:$4 sm:$0xff]  }
  0xfe   :  { %v379_v52 = vpop.f32.mrf.mxu0  ;;  %v645_v53 = vpop.f32.mrf.mxu1 }
  0xff   :  { %v805_v55 = vadd.f32 %v4077_v1, %v745_v50  ;;  %v3003_v59 = vcombine.high %v1034_v51, %v4091_v48  ;;  %v3002_v60 = vcombine.low %v1034_v51, %v4091_v48  ;;  %v852_v62 = vmax.f32 %v804_v49, 0.0  ;;  %v3540_v50 = vld [vmem:[%s4652_s3 + $0x1d4] ss:$8 sps:$4 sm:$0xff]  }
 0x100   :  { %v381_v57 = vpop.f32.mrf.mxu0  ;;  %v647_v58 = vpop.f32.mrf.mxu1  ;;  %v746_v0 = vmax.f32 %v379_v52, %v645_v53  ;;  %v3255_v6 = vpack.c.bf16 %v851_v54, %v850_v56  ;;  %v3543_v51 = vld [vmem:[%s4652_s3 + $0x274] ss:$8 sps:$4 sm:$0xff]  }
 0x101   :  { %v853_v63 = vmax.f32 %v805_v55, 0.0  ;;  %v747_v2 = vmax.f32 %v381_v57, %v647_v58  ;;  %3034 = vmatprep.mubr.msk.bf16.mxu1 %vm1251_vm2, %v3003_v59 }
 0x102   :  { %v383_v4 = vpop.f32.mrf.mxu0  ;;  %v649_v5 = vpop.f32.mrf.mxu1  ;;  %1517 = vmatmul.mubr.bf16.vlgmr.msra.gmra.mxu1 %v3002_v60  ;;  %v806_v15 = vadd.f32 %v4079_v8, %v746_v0 }
 0x103   :  { %v3256_v7 = vpack.c.bf16 %v853_v63, %v852_v62  ;;  %v807_v9 = vadd.f32 %v4077_v1, %v747_v2  ;;  %v748_v10 = vmax.f32 %v383_v4, %v649_v5  ;;  %1955 = vmatpush1.bf16.msra.mxu1 %v3520_v61  ;;  %v3538_v61 = vld [vmem:[%s4652_s3 + $0x1d0] ss:$8 sps:$4 sm:$0xff]   ;;  %v3546_v63 = vld [vmem:[%s4652_s3 + $0x1c4] ss:$8 sps:$4 sm:$0xff]  }
 0x104   :  { %v385_v11 = vpop.f32.mrf.mxu0  ;;  %v651_v12 = vpop.f32.mrf.mxu1  ;;  %1956 = vmatprep.subr.bf16.mxu1 %v3525_v3  ;;  %v854_v31 = vmax.f32 %v806_v15, 0.0  ;;  %v3541_v62 = vld [vmem:[%s4652_s3 + $0x270] ss:$8 sps:$4 sm:$0xff]   ;;  %v3549_v5 = vld [vmem:[%s4652_s3 + $0x264] ss:$8 sps:$4 sm:$0xff]  }
 0x105   :  { %v1036_v14 = vmax.bf16 %v3256_v7, %v3255_v6  ;;  %v808_v16 = vadd.f32 %v4079_v8, %v748_v10  ;;  %v749_v17 = vmax.f32 %v385_v11, %v651_v12  ;;  %v855_v21 = vmax.f32 %v807_v9, 0.0 }
 0x106   :  { %v389_v19 = vpop.f32.mrf.mxu0  ;;  %v655_v20 = vpop.f32.mrf.mxu1 }
 0x107   :  { %v809_v22 = vadd.f32 %v4077_v1, %v749_v17  ;;  %v750_v23 = vmax.f32 %v389_v19, %v655_v20  ;;  %v2967_v26 = vcombine.high %v4091_v48, %v1036_v14  ;;  %v2966_v27 = vcombine.low %v4091_v48, %v1036_v14  ;;  %1957 = vmatpush1.bf16.msra.mxu1 %v3523_v13  ;;  %v3547_v17 = vld [vmem:[%s4652_s3 + $0x260] ss:$8 sps:$4 sm:$0xff]  }
 0x108   :  { %v391_v24 = vpop.f32.mrf.mxu0  ;;  %v657_v25 = vpop.f32.mrf.mxu1  ;;  %v856_v32 = vmax.f32 %v808_v16, 0.0  ;;  %1958 = vmatprep.subr.bf16.mxu1 %v3531_v18  ;;  %v3257_v38 = vpack.c.bf16 %v855_v21, %v854_v31  ;;  %v3544_v16 = vld [vmem:[%s4652_s3 + $0x1c0] ss:$8 sps:$4 sm:$0xff]   ;;  %v3552_v21 = vld [vmem:[%s4652_s3 + $0x1b4] ss:$8 sps:$4 sm:$0xff]  }
 0x109   :  { %v857_v33 = vmax.f32 %v809_v22, 0.0  ;;  %v751_v34 = vmax.f32 %v391_v24, %v657_v25  ;;  %2998 = vmatprep.mubr.msk.bf16.mxu0 %vm1251_vm2, %v2967_v26  ;;  %v810_v42 = vadd.f32 %v4079_v8, %v750_v23  ;;  %v3555_v22 = vld [vmem:[%s4652_s3 + $0x254] ss:$8 sps:$4 sm:$0xff]  }
 0x10a   :  { %v393_v36 = vpop.f32.mrf.mxu0  ;;  %v659_v37 = vpop.f32.mrf.mxu1  ;;  %1297 = vmatmul.mubr.bf16.vlgmr.msra.gmra.mxu0 %v2966_v27 }
 0x10b   :  { %v3258_v39 = vpack.c.bf16 %v857_v33, %v856_v32  ;;  %v811_v40 = vadd.f32 %v4077_v1, %v751_v34  ;;  %v752_v41 = vmax.f32 %v393_v36, %v659_v37  ;;  %1712 = vmatpush1.bf16.msra.mxu0 %v3526_v28  ;;  %1959 = vmatpush1.bf16.msra.mxu1 %v3529_v29  ;;  %v858_v0 = vmax.f32 %v810_v42, 0.0  ;;  %v3550_v32 = vld [vmem:[%s4652_s3 + $0x1b0] ss:$8 sps:$4 sm:$0xff]   ;;  %v3558_v34 = vld [vmem:[%s4652_s3 + $0x1a4] ss:$8 sps:$4 sm:$0xff]  }
 0x10c   :  { %v395_v43 = vpop.f32.mrf.mxu0  ;;  %v661_v44 = vpop.f32.mrf.mxu1  ;;  %1713 = vmatprep.subr.bf16.mxu0 %v3534_v30  ;;  %1960 = vmatprep.subr.bf16.mxu1 %v3537_v35  ;;  %v3553_v33 = vld [vmem:[%s4652_s3 + $0x250] ss:$8 sps:$4 sm:$0xff]  }
 0x10d   :  { %v1037_v47 = vmax.bf16 %v3258_v39, %v3257_v38  ;;  %v812_v48 = vadd.f32 %v4079_v8, %v752_v41  ;;  %v753_v49 = vmax.f32 %v395_v43, %v661_v44  ;;  %v859_v54 = vmax.f32 %v811_v40, 0.0  ;;  %v3561_v39 = vld [vmem:[%s4652_s3 + $0x244] ss:$8 sps:$4 sm:$0xff]  }
 0x10e   :  { %v399_v52 = vpop.f32.mrf.mxu0  ;;  %v665_v53 = vpop.f32.mrf.mxu1 }
 0x10f   :  { %v813_v55 = vadd.f32 %v4077_v1, %v753_v49  ;;  %v754_v56 = vmax.f32 %v399_v52, %v665_v53  ;;  %v4145_v59 = vcombine.high %v1036_v14, %v1037_v47  ;;  %v4147_v60 = vcombine.low %v1036_v14, %v1037_v47  ;;  %1714 = vmatpush1.bf16.msra.mxu0 %v3532_v45  ;;  %v3556_v49 = vld [vmem:[%s4652_s3 + $0x1a0] ss:$8 sps:$4 sm:$0xff]  }
 0x110   :  { %v401_v57 = vpop.f32.mrf.mxu0  ;;  %v667_v58 = vpop.f32.mrf.mxu1  ;;  %1961 = vmatpush1.bf16.msra.mxu1 %v3535_v46  ;;  %v860_v2 = vmax.f32 %v812_v48, 0.0  ;;  %1715 = vmatprep.subr.bf16.mxu0 %v3540_v50  ;;  %v3259_v9 = vpack.c.bf16 %v859_v54, %v858_v0  ;;  %v3559_v50 = vld [vmem:[%s4652_s3 + $0x240] ss:$8 sps:$4 sm:$0xff]   ;;  %v3564_v54 = vld [vmem:[%s4652_s3 + $0x194] ss:$8 sps:$4 sm:$0xff]  }
 0x111   :  { %v861_v3 = vmax.f32 %v813_v55, 0.0  ;;  %v755_v4 = vmax.f32 %v401_v57, %v667_v58  ;;  %1962 = vmatprep.subr.bf16.mxu1 %v3543_v51  ;;  %3035 = vmatprep.mubr.msk.bf16.mxu1 %vm1251_vm2, %v4145_v59  ;;  %v814_v13 = vadd.f32 %v4079_v8, %v754_v56  ;;  %v3567_v55 = vld [vmem:[%s4652_s3 + $0x2f4] ss:$8 sps:$4 sm:$0xff]  }
 0x112   :  { %v403_v6 = vpop.f32.mrf.mxu0  ;;  %v669_v7 = vpop.f32.mrf.mxu1  ;;  %1527 = vmatmul.mubr.bf16.gmra.mxu1 %v4147_v60 }
 0x113   :  { %v3260_v10 = vpack.c.bf16 %v861_v3, %v860_v2  ;;  %v815_v11 = vadd.f32 %v4077_v1, %v755_v4  ;;  %v756_v12 = vmax.f32 %v403_v6, %v669_v7  ;;  %1716 = vmatpush1.bf16.msra.mxu0 %v3538_v61  ;;  %v862_v35 = vmax.f32 %v814_v13, 0.0  ;;  %v3562_v4 = vld [vmem:[%s4652_s3 + $0x190] ss:$8 sps:$4 sm:$0xff]   ;;  %v3570_v6 = vld [vmem:[%s4652_s3 + $0x184] ss:$8 sps:$4 sm:$0xff]  }
 0x114   :  { %v405_v14 = vpop.f32.mrf.mxu0  ;;  %v671_v15 = vpop.f32.mrf.mxu1  ;;  %1963 = vmatpush1.bf16.msra.mxu1 %v3541_v62  ;;  %1717 = vmatprep.subr.bf16.mxu0 %v3546_v63 }
 0x115   :  { %v1038_v18 = vmax.bf16 %v3260_v10, %v3259_v9  ;;  %v816_v19 = vadd.f32 %v4079_v8, %v756_v12  ;;  %v757_v20 = vmax.f32 %v405_v14, %v671_v15  ;;  %1964 = vmatprep.subr.bf16.mxu1 %v3549_v5  ;;  %v863_v25 = vmax.f32 %v815_v11, 0.0  ;;  %v3565_v5 = vld [vmem:[%s4652_s3 + $0x2f0] ss:$8 sps:$4 sm:$0xff]   ;;  %v3573_v12 = vld [vmem:[%s4652_s3 + $0x2e4] ss:$8 sps:$4 sm:$0xff]  }
 0x116   :  { %v409_v23 = vpop.f32.mrf.mxu0  ;;  %v675_v24 = vpop.f32.mrf.mxu1 }
 0x117   :  { %v817_v26 = vadd.f32 %v4077_v1, %v757_v20  ;;  %v758_v27 = vmax.f32 %v409_v23, %v675_v24  ;;  %v4180_v30 = vcombine.high %v1037_v47, %v1038_v18  ;;  %v4182_v31 = vcombine.low %v1037_v47, %v1038_v18  ;;  %1718 = vmatpush1.bf16.msra.mxu0 %v3544_v16  ;;  %v3571_v23 = vld [vmem:[%s4652_s3 + $0x2e0] ss:$8 sps:$4 sm:$0xff]  }
 0x118   :  { %v411_v28 = vpop.f32.mrf.mxu0  ;;  %v677_v29 = vpop.f32.mrf.mxu1  ;;  %1965 = vmatpush1.bf16.msra.mxu1 %v3547_v17  ;;  %v864_v36 = vmax.f32 %v816_v19, 0.0  ;;  %1719 = vmatprep.subr.bf16.mxu0 %v3552_v21  ;;  %v3261_v42 = vpack.c.bf16 %v863_v25, %v862_v35 }
 0x119   :  { %v865_v37 = vmax.f32 %v817_v26, 0.0  ;;  %v759_v38 = vmax.f32 %v411_v28, %v677_v29  ;;  %1966 = vmatprep.subr.bf16.mxu1 %v3555_v22  ;;  %2999 = vmatprep.mubr.msk.bf16.mxu0 %vm1251_vm2, %v4180_v30  ;;  %v818_v46 = vadd.f32 %v4079_v8, %v758_v27  ;;  %v3568_v22 = vld [vmem:[%s4652_s3 + $0x180] ss:$8 sps:$4 sm:$0xff]   ;;  %v3576_v27 = vld [vmem:[%s4652_s3 + $0x234] ss:$8 sps:$4 sm:$0xff]  }
 0x11a   :  { %v413_v40 = vpop.f32.mrf.mxu0  ;;  %v679_v41 = vpop.f32.mrf.mxu1  ;;  %1307 = vmatmul.mubr.bf16.gmra.mxu0 %v4182_v31  ;;  %v3579_v28 = vld [vmem:[%s4652_s3 + $0x2d4] ss:$8 sps:$4 sm:$0xff]  }
 0x11b   :  { %v3262_v43 = vpack.c.bf16 %v865_v37, %v864_v36  ;;  %v819_v44 = vadd.f32 %v4077_v1, %v759_v38  ;;  %v760_v45 = vmax.f32 %v413_v40, %v679_v41  ;;  %1720 = vmatpush1.bf16.msra.mxu0 %v3550_v32  ;;  %v866_v7 = vmax.f32 %v818_v46, 0.0  ;;  %v3574_v40 = vld [vmem:[%s4652_s3 + $0x230] ss:$8 sps:$4 sm:$0xff]  }
 0x11c   :  { %v415_v47 = vpop.f32.mrf.mxu0  ;;  %v681_v48 = vpop.f32.mrf.mxu1  ;;  %1967 = vmatpush1.bf16.msra.mxu1 %v3553_v33  ;;  %1721 = vmatprep.subr.bf16.mxu0 %v3558_v34  ;;  %v3577_v41 = vld [vmem:[%s4652_s3 + $0x2d0] ss:$8 sps:$4 sm:$0xff]  }
 0x11d   :  { %v1039_v51 = vmax.bf16 %v3262_v43, %v3261_v42  ;;  %v820_v52 = vadd.f32 %v4079_v8, %v760_v45  ;;  %v761_v53 = vmax.f32 %v415_v47, %v681_v48  ;;  %1968 = vmatprep.subr.bf16.mxu1 %v3561_v39  ;;  %v867_v58 = vmax.f32 %v819_v44, 0.0  ;;  %v3582_v42 = vld [vmem:[%s4652_s3 + $0x224] ss:$8 sps:$4 sm:$0xff]  }
 0x11e   :  { %v419_v56 = vpop.f32.mrf.mxu0  ;;  %v685_v57 = vpop.f32.mrf.mxu1  ;;  %v3585_v47 = vld [vmem:[%s4652_s3 + $0x2c4] ss:$8 sps:$4 sm:$0xff]  }
 0x11f   :  { %v821_v61 = vadd.f32 %v4077_v1, %v761_v53  ;;  %v762_v62 = vmax.f32 %v419_v56, %v685_v57  ;;  %v4215_v2 = vcombine.high %v1038_v18, %v1039_v51  ;;  %v4217_v3 = vcombine.low %v1038_v18, %v1039_v51  ;;  %1722 = vmatpush1.bf16.msra.mxu0 %v3556_v49  ;;  %v3580_v57 = vld [vmem:[%s4652_s3 + $0x220] ss:$8 sps:$4 sm:$0xff]  }
 0x120   :  { %v421_v63 = vpop.f32.mrf.mxu0  ;;  %v687_v0 = vpop.f32.mrf.mxu1  ;;  %1969 = vmatpush1.bf16.msra.mxu1 %v3559_v50  ;;  %v868_v9 = vmax.f32 %v820_v52, 0.0  ;;  %1723 = vmatprep.subr.bf16.mxu0 %v3564_v54  ;;  %v3263_v15 = vpack.c.bf16 %v867_v58, %v866_v7  ;;  %v3583_v58 = vld [vmem:[%s4652_s3 + $0x2c0] ss:$8 sps:$4 sm:$0xff]  }
 0x121   :  { %v869_v10 = vmax.f32 %v821_v61, 0.0  ;;  %v763_v11 = vmax.f32 %v421_v63, %v687_v0  ;;  %1978 = vmatprep.subr.bf16.mxu1 %v3567_v55  ;;  %3036 = vmatprep.mubr.msk.bf16.mxu1 %vm1251_vm2, %v4215_v2  ;;  %v822_v19 = vadd.f32 %v4079_v8, %v762_v62  ;;  %v3588_v0 = vld [vmem:[%s4652_s3 + $0x214] ss:$8 sps:$4 sm:$0xff]  }
 0x122   :  { %v423_v13 = vpop.f32.mrf.mxu0  ;;  %v689_v14 = vpop.f32.mrf.mxu1  ;;  %1537 = vmatmul.mubr.bf16.gmra.mxu1 %v4217_v3 }
 0x123   :  { %v3264_v16 = vpack.c.bf16 %v869_v10, %v868_v9  ;;  %v823_v17 = vadd.f32 %v4077_v1, %v763_v11  ;;  %v764_v18 = vmax.f32 %v423_v13, %v689_v14  ;;  %1724 = vmatpush1.bf16.msra.mxu0 %v3562_v4  ;;  %v870_v43 = vmax.f32 %v822_v19, 0.0  ;;  %v3586_v13 = vld [vmem:[%s4652_s3 + $0x210] ss:$8 sps:$4 sm:$0xff]  }
 0x124   :  { %v425_v20 = vpop.f32.mrf.mxu0  ;;  %v691_v21 = vpop.f32.mrf.mxu1  ;;  %1979 = vmatpush2.bf16.msra.mxu1 %v3565_v5  ;;  %1725 = vmatprep.subr.bf16.mxu0 %v3570_v6 }
 0x125   :  { %v1040_v24 = vmax.bf16 %v3264_v16, %v3263_v15  ;;  %v824_v25 = vadd.f32 %v4079_v8, %v764_v18  ;;  %v765_v26 = vmax.f32 %v425_v20, %v691_v21  ;;  %1980 = vmatprep.subr.bf16.mxu1 %v3573_v12  ;;  %v871_v33 = vmax.f32 %v823_v17, 0.0  ;;  %v3591_v17 = vld [vmem:[%s4652_s3 + $0x204] ss:$8 sps:$4 sm:$0xff]  }
 0x126   :  { %v429_v29 = vpop.f32.mrf.mxu0  ;;  %v695_v32 = vpop.f32.mrf.mxu1 }
 0x127   :  { %v825_v34 = vadd.f32 %v4077_v1, %v765_v26  ;;  %v766_v35 = vmax.f32 %v429_v29, %v695_v32  ;;  %v4250_v38 = vcombine.high %v1039_v51, %v1040_v24  ;;  %v4252_v39 = vcombine.low %v1039_v51, %v1040_v24  ;;  %1726 = vmatpush1.bf16.msra.mxu0 %v3568_v22  ;;  %v3594_v26 = vld [vmem:[%s4652_s3 + $0x374] ss:$8 sps:$4 sm:$0xff]  }
 0x128   :  { %v431_v36 = vpop.f32.mrf.mxu0  ;;  %v697_v37 = vpop.f32.mrf.mxu1  ;;  %1981 = vmatpush2.bf16.msra.mxu1 %v3571_v23  ;;  %v872_v44 = vmax.f32 %v824_v25, 0.0  ;;  %1735 = vmatprep.subr.bf16.mxu0 %v3576_v27  ;;  %v3265_v50 = vpack.c.bf16 %v871_v33, %v870_v43 }
 0x129   :  { %v873_v45 = vmax.f32 %v825_v34, 0.0  ;;  %v767_v46 = vmax.f32 %v431_v36, %v697_v37  ;;  %1982 = vmatprep.subr.bf16.mxu1 %v3579_v28  ;;  %3000 = vmatprep.mubr.msk.bf16.mxu0 %vm1251_vm2, %v4250_v38  ;;  %v826_v54 = vadd.f32 %v4079_v8, %v766_v35 }
 0x12a   :  { %v433_v48 = vpop.f32.mrf.mxu0  ;;  %v699_v49 = vpop.f32.mrf.mxu1  ;;  %1317 = vmatmul.mubr.bf16.gmra.mxu0 %v4252_v39 }
 0x12b   :  { %v3266_v51 = vpack.c.bf16 %v873_v45, %v872_v44  ;;  %v827_v52 = vadd.f32 %v4077_v1, %v767_v46  ;;  %v768_v53 = vmax.f32 %v433_v48, %v699_v49  ;;  %1736 = vmatpush2.bf16.msra.mxu0 %v3574_v40  ;;  %v874_v14 = vmax.f32 %v826_v54, 0.0 }
 0x12c   :  { %v435_v55 = vpop.f32.mrf.mxu0  ;;  %v701_v56 = vpop.f32.mrf.mxu1  ;;  %1983 = vmatpush2.bf16.msra.mxu1 %v3577_v41  ;;  %1737 = vmatprep.subr.bf16.mxu0 %v3582_v42 }
 0x12d   :  { %v1041_v61 = vmax.bf16 %v3266_v51, %v3265_v50  ;;  %v828_v62 = vadd.f32 %v4079_v8, %v768_v53  ;;  %v769_v63 = vmax.f32 %v435_v55, %v701_v56  ;;  %1984 = vmatprep.subr.bf16.mxu1 %v3585_v47  ;;  %v875_v6 = vmax.f32 %v827_v52, 0.0 }
 0x12e   :  { %v439_v4 = vpop.f32.mrf.mxu0  ;;  %v705_v5 = vpop.f32.mrf.mxu1 }
 0x12f   :  { %v829_v7 = vadd.f32 %v4077_v1, %v769_v63  ;;  %v4282_v11 = vcombine.high %v1040_v24, %v1041_v61  ;;  %v4284_v12 = vcombine.low %v1040_v24, %v1041_v61  ;;  %1738 = vmatpush2.bf16.msra.mxu0 %v3580_v57  ;;  %v876_v15 = vmax.f32 %v828_v62, 0.0  ;;  %v3589_v24 = vld [vmem:[%s4652_s3 + $0x200] ss:$8 sps:$4 sm:$0xff]  }
 0x130   :  { %v441_v9 = vpop.f32.mrf.mxu0  ;;  %v707_v10 = vpop.f32.mrf.mxu1  ;;  %1985 = vmatpush2.bf16.msra.mxu1 %v3583_v58  ;;  %1739 = vmatprep.subr.bf16.mxu0 %v3588_v0  ;;  %v3267_v20 = vpack.c.bf16 %v875_v6, %v874_v14  ;;  %v770_v27 = vmax.f32 %v439_v4, %v705_v5  ;;  %v3603_v14 = vld [vmem:[%s4652_s3 + $0x344] ss:$8 sps:$4 sm:$0xff]  }
 0x131   :  { %v877_v16 = vmax.f32 %v829_v7, 0.0  ;;  %3037 = vmatprep.mubr.msk.bf16.mxu1 %vm1251_vm2, %v4282_v11  ;;  %v771_v28 = vmax.f32 %v441_v9, %v707_v10  ;;  %v3595_v7 = vld [vmem:[%s4652_s3 + $0x360] ss:$8 sps:$4 sm:$0xff]   ;;  %v3600_v10 = vld [vmem:[%s4652_s3 + $0x354] ss:$8 sps:$4 sm:$0xff]  }
 0x132   :  { %v443_v18 = vpop.f32.mrf.mxu0  ;;  %v709_v19 = vpop.f32.mrf.mxu1  ;;  %1547 = vmatmul.mubr.bf16.gmra.mxu1 %v4284_v12  ;;  %v830_v42 = vadd.f32 %v4079_v8, %v770_v27  ;;  %v3615_v27 = vld [vmem:[%s4652_s3 + $0x304] ss:$8 sps:$4 sm:$0xff]  }
 0x133   :  { %v3268_v21 = vpack.c.bf16 %v877_v16, %v876_v15  ;;  %3142 = vmatprep.mubr.msk.bf16.mxu1 %vm1251_vm2, %v4180_v30  ;;  %1740 = vmatpush2.bf16.msra.mxu0 %v3586_v13  ;;  %v772_v29 = vmax.f32 %v443_v18, %v709_v19  ;;  %v831_v43 = vadd.f32 %v4077_v1, %v771_v28  ;;  %v3601_v16 = vld [vmem:[%s4652_s3 + $0x340] ss:$8 sps:$4 sm:$0xff]   ;;  %v3604_v18 = vld [vmem:[%s4652_s3 + $0x330] ss:$8 sps:$4 sm:$0xff]   ;;  %v3609_v19 = vld [vmem:[%s4652_s3 + $0x324] ss:$8 sps:$4 sm:$0xff]  }
 0x134   :  { %v445_v22 = vpop.f32.mrf.mxu0  ;;  %v711_v23 = vpop.f32.mrf.mxu1  ;;  %1741 = vmatprep.subr.bf16.mxu0 %v3591_v17  ;;  %v878_v57 = vmax.f32 %v830_v42, 0.0  ;;  %v3606_v17 = vld [vmem:[%s4652_s3 + $0x334] ss:$8 sps:$4 sm:$0xff]   ;;  %v3613_v28 = vld [vmem:[%s4652_s3 + $0x300] ss:$8 sps:$4 sm:$0xff]  }
 0x135   :  { %v4300_v25 = vmax.bf16 %v3268_v21, %v3267_v20  ;;  %v773_v30 = vmax.f32 %v445_v22, %v711_v23  ;;  %v832_v44 = vadd.f32 %v4079_v8, %v772_v29  ;;  %v879_v58 = vmax.f32 %v831_v43, 0.0  ;;  %v3607_v22 = vld [vmem:[%s4652_s3 + $0x320] ss:$8 sps:$4 sm:$0xff]   ;;  %v3612_v23 = vld [vmem:[%s4652_s3 + $0x314] ss:$8 sps:$4 sm:$0xff]  }
 0x136   :  { %v449_v32 = vpop.f32.mrf.mxu0  ;;  %v715_v33 = vpop.f32.mrf.mxu1  ;;  %v3618_v29 = vld [vmem:[%s4652_s3 + $0x3b4] ss:$8 sps:$4 sm:$0xff]   ;;  %v3627_v42 = vld [vmem:[%s4652_s3 + $0x384] ss:$8 sps:$4 sm:$0xff]  }
 0x137   :  { %v2973_v34 = vcombine.high %v1041_v61, %v4300_v25  ;;  %v2972_v35 = vcombine.low %v1041_v61, %v4300_v25  ;;  %1742 = vmatpush2.bf16.msra.mxu0 %v3589_v24  ;;  %v774_v36 = vmax.f32 %v449_v32, %v715_v33  ;;  %v833_v48 = vadd.f32 %v4077_v1, %v773_v30  ;;  %v3610_v24 = vld [vmem:[%s4652_s3 + $0x310] ss:$8 sps:$4 sm:$0xff]  }
 0x138   :  { %v451_v37 = vpop.f32.mrf.mxu0  ;;  %v717_v40 = vpop.f32.mrf.mxu1  ;;  %2197 = vmatprep.subr.bf16.mxu0 %v3594_v26  ;;  %v880_v61 = vmax.f32 %v832_v44, 0.0  ;;  %v3269_v5 = vpack.c.bf16 %v879_v58, %v878_v57  ;;  %v3616_v33 = vld [vmem:[%s4652_s3 + $0x3b0] ss:$8 sps:$4 sm:$0xff]  }
 0x139   :  { %3001 = vmatprep.mubr.msk.bf16.mxu0 %vm1251_vm2, %v2973_v34  ;;  %v775_v41 = vmax.f32 %v451_v37, %v717_v40  ;;  %v834_v45 = vadd.f32 %v4079_v8, %v774_v36  ;;  %v3624_v36 = vld [vmem:[%s4652_s3 + $0x394] ss:$8 sps:$4 sm:$0xff]  }
 0x13a   :  { %1327 = vmatmul.mubr.bf16.gmra.mxu0 %v2972_v35  ;;  %v453_v46 = vpop.f32.mrf.mxu0  ;;  %v719_v47 = vpop.f32.mrf.mxu1  ;;  %1987 = vmatmul.mubr.bf16.vlgmr.msra.gmra.mxu1 %v4182_v31  ;;  %v881_v31 = vmax.f32 %v833_v48, 0.0 }
 0x13b   :  { %3088 = vmatprep.mubr.msk.bf16.mxu0 %vm1251_vm2, %v4145_v59  ;;  %v835_v49 = vadd.f32 %v4077_v1, %v775_v41  ;;  %v776_v50 = vmax.f32 %v453_v46, %v719_v47  ;;  %3143 = vmatprep.mubr.msk.bf16.mxu1 %vm1251_vm2, %v4250_v38  ;;  %v882_v53 = vmax.f32 %v834_v45, 0.0  ;;  %v3592_v59 = vld [vmem:[%s4652_s3 + $0x370] ss:$8 sps:$4 sm:$0xff]   ;;  %v3597_v38 = vld [vmem:[%s4652_s3 + $0x364] ss:$8 sps:$4 sm:$0xff]  }
 0x13c   :  { %v455_v51 = vpop.f32.mrf.mxu0  ;;  %v721_v52 = vpop.f32.mrf.mxu1  ;;  %v3270_v6 = vpack.c.bf16 %v881_v31, %v880_v61  ;;  %v3622_v41 = vld [vmem:[%s4652_s3 + $0x390] ss:$8 sps:$4 sm:$0xff]   ;;  %v3625_v45 = vld [vmem:[%s4652_s3 + $0x380] ss:$8 sps:$4 sm:$0xff]  }
 0x13d   :  { %v883_v54 = vmax.f32 %v835_v49, 0.0  ;;  %v836_v55 = vadd.f32 %v4079_v8, %v776_v50  ;;  %v777_v56 = vmax.f32 %v455_v51, %v721_v52 }
 0x13e   :  { %v1043_v13 = vmax.bf16 %v3270_v6, %v3269_v5  ;;  %v459_v32 = vpop.f32.mrf.mxu0  ;;  %v3637_v5 = vld [vmem:[%s4654_s5 + $0x18] sm:$0xff]   ;;  %v3638_v6 = vld [vmem:[%s4654_s5 + $0x50] sm:$0xff]  }
 0x13f   :  { %v884_v62 = vmax.f32 %v836_v55, 0.0  ;;  %v837_v63 = vadd.f32 %v4077_v1, %v777_v56  ;;  %v3271_v0 = vpack.c.bf16 %v883_v54, %v882_v53 }
 0x140   :  { %v3063_v21 = vcombine.high %v4300_v25, %v1043_v13  ;;  %v3062_v26 = vcombine.low %v4300_v25, %v1043_v13  ;;  %v725_v25 = vpop.f32.mrf.mxu1  ;;  %v461_v30 = vpop.f32.mrf.mxu0 }
 0x141   :  { %v885_v4 = vmax.f32 %v837_v63, 0.0  ;;  %v778_v46 = vmax.f32 %v459_v32, %v725_v25  ;;  %v3633_v63 = vld [vmem:[%s4654_s5 + $0x28] sm:$0xff]  }
 0x142   :  { %1744 = vmatmul.mubr.bf16.vlgmr.msra.gmra.mxu0 %v4147_v60  ;;  %1997 = vmatmul.mubr.bf16.gmra.mxu1 %v4252_v39  ;;  %v3598_v39 = vld [vmem:[%s4652_s3 + $0x350] ss:$8 sps:$4 sm:$0xff]   ;;  %v463_v37 = vpop.f32.mrf.mxu0 }
 0x143   :  { %2198 = vmatpush1.bf16.msra.mxu0 %v3592_v59  ;;  %v3272_v9 = vpack.c.bf16 %v885_v4, %v884_v62  ;;  %3089 = vmatprep.mubr.msk.bf16.mxu0 %vm1251_vm2, %v4215_v2  ;;  %v838_v50 = vadd.f32 %v4079_v8, %v778_v46  ;;  %v3631_v59 = vld [vmem:[%s4654_s5 + $0x30] sm:$0xff]   ;;  %v3632_v62 = vld [vmem:[%s4654_s5 + $0x68] sm:$0xff]   ;;  %v3636_v4 = vld [vmem:[%s4654_s5 + $0x58] sm:$0xff]  }
 0x144   :  { %3144 = vmatprep.mubr.msk.bf16.mxu1 %vm1251_vm2, %v2973_v34  ;;  %2199 = vmatprep.subr.bf16.mxu0 %v3597_v38  ;;  %v727_v34 = vpop.f32.mrf.mxu1  ;;  %v465_v43 = vpop.f32.mrf.mxu0  ;;  %v3634_v38 = vld [vmem:[%s4654_s5 + $0x60] sm:$0xff]  }
 0x145   :  { %v4338_v60 = vmax.bf16 %v3272_v9, %v3271_v0  ;;  %v779_v47 = vmax.f32 %v461_v30, %v727_v34  ;;  %v886_v54 = vmax.f32 %v838_v50, 0.0  ;;  %v3635_v0 = vld [vmem:[%s4654_s5 + $0x20] sm:$0xff]   ;;  %v3640_v9 = vld [vmem:[%s4654_s5 + $0x48] sm:$0xff]  }
 0x146   :  { %v729_v40 = vpop.f32.mrf.mxu1 }
 0x147   :  { %2200 = vmatpush1.bf16.msra.mxu0 %v3595_v7  ;;  %v3117_v15 = vcombine.high %v1043_v13, %v4338_v60  ;;  %v3116_v20 = vcombine.low %v1043_v13, %v4338_v60  ;;  %v780_v48 = vmax.f32 %v463_v37, %v729_v40  ;;  %v839_v51 = vadd.f32 %v4077_v1, %v779_v47  ;;  %v3639_v7 = vld [vmem:[%s4654_s5 + $0x10] sm:$0xff]   ;;  %v3643_v13 = vld [vmem:[%s4654_s5] sm:$0xff]  }
 0x148   :  { %2201 = vmatprep.subr.bf16.mxu0 %v3600_v10  ;;  %v731_v44 = vpop.f32.mrf.mxu1  ;;  %v3641_v10 = vld [vmem:[%s4654_s5 + $0x8] sm:$0xff]  }
 0x149   :  { %v781_v49 = vmax.f32 %v465_v43, %v731_v44  ;;  %v840_v52 = vadd.f32 %v4079_v8, %v780_v48  ;;  %v887_v55 = vmax.f32 %v839_v51, 0.0 }
 0x14a   :  { %1754 = vmatmul.mubr.bf16.gmra.mxu0 %v4217_v3  ;;  %2007 = vmatmul.mubr.bf16.gmra.mxu1 %v2972_v35  ;;  %v3619_v35 = vld [vmem:[%s4652_s3 + $0x3a0] ss:$8 sps:$4 sm:$0xff]  }
 0x14b   :  { %2202 = vmatpush1.bf16.msra.mxu0 %v3598_v39  ;;  %3090 = vmatprep.mubr.msk.bf16.mxu0 %vm1251_vm2, %v4282_v11  ;;  %v841_v53 = vadd.f32 %v4077_v1, %v781_v49  ;;  %v888_v56 = vmax.f32 %v840_v52, 0.0  ;;  %v3273_v58 = vpack.c.bf16 %v887_v55, %v886_v54  ;;  %v3644_v39 = vld [vmem:[%s4654_s5 + $0xf8] sm:$0xff]  }
 0x14c   :  { %2203 = vmatprep.subr.bf16.mxu0 %v3603_v14  ;;  %3145 = vmatprep.mubr.msk.bf16.mxu1 %vm1251_vm2, %v3117_v15 }
 0x14d   :  { %v889_v57 = vmax.f32 %v841_v53, 0.0 }
 0x14f   :  { %2204 = vmatpush1.bf16.msra.mxu0 %v3601_v16  ;;  %v3274_v61 = vpack.c.bf16 %v889_v57, %v888_v56 }
 0x150   :  { %2205 = vmatprep.subr.bf16.mxu0 %v3606_v17 }
 0x151   :  { %v1045_v31 = vmax.bf16 %v3274_v61, %v3273_v58 }
 0x152   :  { %1764 = vmatmul.mubr.bf16.gmra.mxu0 %v4284_v12  ;;  %2017 = vmatmul.mubr.bf16.gmra.mxu1 %v3116_v20 }
 0x153   :  { %2206 = vmatpush1.bf16.msra.mxu0 %v3604_v18  ;;  %3091 = vmatprep.mubr.msk.bf16.mxu0 %vm1251_vm2, %v3063_v21  ;;  %v3171_v8 = vcombine.high %v4338_v60, %v1045_v31  ;;  %v3170_v1 = vcombine.low %v4338_v60, %v1045_v31  ;;  %v3642_v60 = vld [vmem:[%s4654_s5 + $0x40] sm:$0xff]  }
 0x154   :  { %2207 = vmatprep.subr.bf16.mxu0 %v3609_v19 }
 0x157   :  { %2208 = vmatpush1.bf16.msra.mxu0 %v3607_v22 }
 0x158   :  { %2209 = vmatprep.subr.bf16.mxu0 %v3612_v23 }
 0x15a   :  { %1774 = vmatmul.mubr.bf16.gmra.mxu0 %v3062_v26 }
 0x15b   :  { %2210 = vmatpush1.bf16.msra.mxu0 %v3610_v24  ;;  %3196 = vmatprep.mubr.msk.bf16.mxu0 %vm1251_vm2, %v4215_v2  ;;  %v3621_v2 = vld [vmem:[%s4652_s3 + $0x3a4] ss:$8 sps:$4 sm:$0xff]  }
 0x15c   :  { %2211 = vmatprep.subr.bf16.mxu0 %v3615_v27 }
 0x15f   :  { %2212 = vmatpush1.bf16.msra.mxu0 %v3613_v28 }
 0x160   :  { %2221 = vmatprep.subr.bf16.mxu0 %v3618_v29 }
 0x163   :  { %2222 = vmatpush2.bf16.msra.mxu0 %v3616_v33 }
 0x164   :  { %2223 = vmatprep.subr.bf16.mxu0 %v3621_v2 }
 0x167   :  { %2224 = vmatpush2.bf16.msra.mxu0 %v3619_v35 }
 0x168   :  { %2225 = vmatprep.subr.bf16.mxu0 %v3624_v36 }
 0x16b   :  { %2226 = vmatpush2.bf16.msra.mxu0 %v3622_v41 }
 0x16c   :  { %2227 = vmatprep.subr.bf16.mxu0 %v3627_v42 }
 0x16f   :  { %2228 = vmatpush2.bf16.msra.mxu0 %v3625_v45 }
 0x172   :  { %2230 = vmatmul.mubr.bf16.vlgmr.msra.gmra.mxu0 %v4217_v3  ;;  %v3628_v3 = vld [vmem:[%s4654_s5 + $0x78] sm:$0xff]  }
 0x173   :  { %3197 = vmatprep.mubr.msk.bf16.mxu0 %vm1251_vm2, %v4282_v11  ;;  %v3629_v11 = vld [vmem:[%s4654_s5 + $0x38] sm:$0xff]   ;;  %3283 = vmatprep.subr.bf16.mxu1 %v3628_v3 }
 0x174   :  { %3284 = vmatpush3.bf16.msra.mxu1 %v3629_v11 }
 0x17a   :  { %2240 = vmatmul.mubr.bf16.gmra.mxu0 %v4284_v12  ;;  %v3630_v12 = vld [vmem:[%s4654_s5 + $0x70] sm:$0xff]  }
 0x17b   :  { %3198 = vmatprep.mubr.msk.bf16.mxu0 %vm1251_vm2, %v3063_v21  ;;  %3285 = vmatprep.subr.bf16.mxu1 %v3630_v12 }
 0x17c   :  { %3286 = vmatpush3.bf16.msra.mxu1 %v3631_v59 }
 0x17d   :  { %3287 = vmatprep.subr.bf16.mxu1 %v3632_v62 }
 0x180   :  { %3288 = vmatpush3.bf16.msra.mxu1 %v3633_v63 }
 0x181   :  { %3289 = vmatprep.subr.bf16.mxu1 %v3634_v38 }
 0x182   :  { %2250 = vmatmul.mubr.bf16.gmra.mxu0 %v3062_v26 }
 0x183   :  { %3199 = vmatprep.mubr.msk.bf16.mxu0 %vm1251_vm2, %v3171_v8 }
 0x184   :  { %3290 = vmatpush3.bf16.msra.mxu1 %v3635_v0 }
 0x185   :  { %3291 = vmatprep.subr.bf16.mxu1 %v3636_v4 }
 0x188   :  { %3292 = vmatpush3.bf16.msra.mxu1 %v3637_v5 }
 0x189   :  { %3293 = vmatprep.subr.bf16.mxu1 %v3638_v6 }
 0x18a   :  { %2260 = vmatmul.mubr.bf16.gmra.mxu0 %v3170_v1 }
 0x18c   :  { %3294 = vmatpush3.bf16.msra.mxu1 %v3639_v7 }
 0x18d   :  { %3295 = vmatprep.subr.bf16.mxu1 %v3640_v9 }
 0x190   :  { %3296 = vmatpush3.bf16.msra.mxu1 %v3641_v10 }
 0x191   :  { %3297 = vmatprep.subr.bf16.mxu1 %v3642_v60 }
 0x194   :  { %3298 = vmatpush3.bf16.msra.mxu1 %v3643_v13 }
 0x195   :  { %3305 = vmatprep.subr.bf16.mxu1 %v3644_v39 }
 0x1c2   :  { %v1518_v16 = vpop.f32.mrf.mxu1 }
 0x1c4   :  { %v1520_v18 = vpop.f32.mrf.mxu1 }
 0x1c6   :  { %v1522_v21 = vpop.f32.mrf.mxu1 }
 0x1c8   :  { %v1524_v23 = vpop.f32.mrf.mxu1 }
 0x1ca   :  { %v1298_v14 = vpop.f32.mrf.mxu0 }
 0x1cb   :  { %v1519_v0 = vadd.f32 %v1518_v16, %v1298_v14 }
 0x1cc   :  { %v1300_v15 = vpop.f32.mrf.mxu0 }
 0x1cd   :  { %v1521_v4 = vadd.f32 %v1520_v18, %v1300_v15 }
 0x1ce   :  { %v1302_v17 = vpop.f32.mrf.mxu0 }
 0x1cf   :  { %v1523_v9 = vadd.f32 %v1522_v21, %v1302_v17  ;;  %v4535_v17 = vld [vmem:[%s4655_s4] ss:$0 sm:$0xff] }
 0x1d0   :  { %v1304_v19 = vpop.f32.mrf.mxu0 }
 0x1d1   :  { %v1525_v60 = vadd.f32 %v1524_v23, %v1304_v19 }
 0x1d2   :  { %v1528_v24 = vpop.f32.mrf.mxu1 }
 0x1d4   :  { %v1530_v27 = vpop.f32.mrf.mxu1 }
 0x1d6   :  { %v4482_v32 = vpop.f32.mrf.mxu1 }
 0x1d8   :  { %v4486_v33 = vpop.f32.mrf.mxu1 }
 0x1da   :  { %v4472_v20 = vpop.f32.mrf.mxu0 }
 0x1dc   :  { %v4474_v22 = vpop.f32.mrf.mxu0 }
 0x1de   :  { %v4476_v26 = vpop.f32.mrf.mxu0 }
 0x1e0   :  { %v4478_v28 = vpop.f32.mrf.mxu0 }
 0x1e2   :  { %v4488_v2 = vpop.f32.mrf.mxu1 }
 0x1e4   :  { %v4492_v34 = vpop.f32.mrf.mxu1 }
 0x1e6   :  { %v4498_v37 = vpop.f32.mrf.mxu1 }
 0x1e8   :  { %v4504_v42 = vpop.f32.mrf.mxu1 }
 0x1ea   :  { %v4480_v29 = vpop.f32.mrf.mxu0 }
 0x1ec   :  { %v4484_v25 = vpop.f32.mrf.mxu0 }
 0x1ee   :  { %v4490_v30 = vpop.f32.mrf.mxu0 }
 0x1f0   :  { %v4494_v35 = vpop.f32.mrf.mxu0 }
 0x1f2   :  { %v4508_v44 = vpop.f32.mrf.mxu1 }
 0x1f4   :  { %v4510_v47 = vpop.f32.mrf.mxu1 }
 0x1f6   :  { %v4512_v50 = vpop.f32.mrf.mxu1 }
 0x1f7   :  { %4662 = vst [vmem:[#allocation4_spill] sm:$0xff] %v4512_v50 }
 0x1f8   :  { %v4514_v53 = vpop.f32.mrf.mxu1 }
 0x1f9   :  { %4663 = vst [vmem:[#allocation5_spill] sm:$0xff] %v4514_v53 }
 0x1fa   :  { %v4496_v36 = vpop.f32.mrf.mxu0  ;;  %v1988_v56 = vpop.f32.mrf.mxu1 }
 0x1fc   :  { %v4500_v40 = vpop.f32.mrf.mxu0  ;;  %v1990_v58 = vpop.f32.mrf.mxu1 }
 0x1fe   :  { %v4502_v41 = vpop.f32.mrf.mxu0  ;;  %v1992_v31 = vpop.f32.mrf.mxu1 }
 0x1ff   :  { %4660 = vst [vmem:[#allocation2_spill] sm:$0xff] %v4502_v41 }
 0x200   :  { %v4506_v43 = vpop.f32.mrf.mxu0  ;;  %v1994_v1 = vpop.f32.mrf.mxu1 }
 0x201   :  { %4661 = vst [vmem:[#allocation3_spill] sm:$0xff] %v4506_v43 }
 0x202   :  { %v1745_v45 = vpop.f32.mrf.mxu0  ;;  %v1998_v11 = vpop.f32.mrf.mxu1 }
 0x203   :  { %v1784_v6 = vadd.f32 %v1745_v45, %v1519_v0 }
 0x204   :  { %v1747_v46 = vpop.f32.mrf.mxu0  ;;  %v2000_v59 = vpop.f32.mrf.mxu1 }
 0x205   :  { %v1785_v7 = vadd.f32 %v1747_v46, %v1521_v4  ;;  %v2027_v50 = vadd.f32 %v1988_v56, %v1784_v6 }
 0x206   :  { %v1749_v48 = vpop.f32.mrf.mxu0  ;;  %v2002_v63 = vpop.f32.mrf.mxu1 }
 0x207   :  { %v1786_v13 = vadd.f32 %v1749_v48, %v1523_v9  ;;  %v2028_v41 = vadd.f32 %v1990_v58, %v1785_v7  ;;  %v1533_v48 = vadd.f32 %v4482_v32, %v4476_v26  ;;  %v1541_v32 = vadd.f32 %v4492_v34, %v4484_v25 }
 0x208   :  { %v1751_v49 = vpop.f32.mrf.mxu0  ;;  %v2004_v5 = vpop.f32.mrf.mxu1 }
 0x209   :  { %v1787_v43 = vadd.f32 %v1751_v49, %v1525_v60  ;;  %v2029_v18 = vadd.f32 %v1992_v31, %v1786_v13 }
 0x20a   :  { %v1755_v51 = vpop.f32.mrf.mxu0  ;;  %v2008_v39 = vpop.f32.mrf.mxu1 }
 0x20b   :  { %v2030_v46 = vadd.f32 %v1994_v1, %v1787_v43  ;;  %v1539_v43 = vadd.f32 %v4488_v2, %v4480_v29  ;;  %v1543_v29 = vadd.f32 %v4498_v37, %v4490_v30  ;;  %v1545_v2 = vadd.f32 %v4504_v42, %v4494_v35 }
 0x20c   :  { %v1757_v52 = vpop.f32.mrf.mxu0  ;;  %v2010_v16 = vpop.f32.mrf.mxu1  ;;  %v1549_v35 = vadd.f32 %v4508_v44, %v4496_v36  ;;  %v4669_v36 = vld [vmem:[#allocation2_spill] sm:$0xff]  ;;  %v4670_v44 = vld [vmem:[#allocation4_spill] sm:$0xff] }
 0x20e   :  { %v1759_v54 = vpop.f32.mrf.mxu0 }
 0x20f   :  { %v1790_v49 = vadd.f32 %v1759_v54, %v1533_v48 }
 0x210   :  { %v1761_v55 = vpop.f32.mrf.mxu0 }
 0x212   :  { %v1765_v57 = vpop.f32.mrf.mxu0 }
 0x213   :  { %v1792_v54 = vadd.f32 %v1765_v57, %v1539_v43 }
 0x214   :  { %v4516_v61 = vpop.f32.mrf.mxu0 }
 0x216   :  { %v4518_v8 = vpop.f32.mrf.mxu0 }
 0x217   :  { %v1794_v9 = vadd.f32 %v4518_v8, %v1543_v29 }
 0x218   :  { %v4520_v3 = vpop.f32.mrf.mxu0 }
 0x21a   :  { %v4522_v12 = vpop.f32.mrf.mxu0 }
 0x21b   :  { %4664 = vst [vmem:[#allocation6_spill] sm:$0xff] %v4522_v12 }
 0x21c   :  { %v4524_v62 = vpop.f32.mrf.mxu0 }
 0x21d   :  { %4665 = vst [vmem:[#allocation7_spill] sm:$0xff] %v4524_v62  ;;  %v1529_v62 = vadd.f32 %v1528_v24, %v4472_v20 }
 0x21e   :  { %v4526_v38 = vpop.f32.mrf.mxu0 }
 0x21f   :  { %4666 = vst [vmem:[#allocation8_spill] sm:$0xff] %v4526_v38  ;;  %v1531_v38 = vadd.f32 %v1530_v27, %v4474_v22  ;;  %v1788_v21 = vadd.f32 %v1755_v51, %v1529_v62  ;;  %v1535_v22 = vadd.f32 %v4486_v33, %v4478_v28  ;;  %v2033_v62 = vadd.f32 %v2002_v63, %v1790_v49 }
 0x220   :  { %v4528_v10 = vpop.f32.mrf.mxu0 }
 0x221   :  { %v1789_v23 = vadd.f32 %v1757_v52, %v1531_v38  ;;  %v1791_v56 = vadd.f32 %v1761_v55, %v1535_v22  ;;  %v2031_v51 = vadd.f32 %v1998_v11, %v1788_v21  ;;  %v1793_v55 = vadd.f32 %v4516_v61, %v1541_v32 }
 0x222   :  { %v2035_v61 = vadd.f32 %v2008_v39, %v1792_v54  ;;  %v4667_v39 = vld [vmem:[#allocation6_spill] sm:$0xff] }
 0x223   :  { %v2032_v52 = vadd.f32 %v2000_v59, %v1789_v23  ;;  %v2034_v0 = vadd.f32 %v2004_v5, %v1791_v56  ;;  %v1795_v5 = vadd.f32 %v4520_v3, %v1545_v2  ;;  %v2036_v30 = vadd.f32 %v2010_v16, %v1793_v55  ;;  %v3646_v55 = vld [vmem:[%s4654_s5 + $0xf0] sm:$0xff]  }
 0x224   :  { %v1796_v23 = vadd.f32 %v4667_v39, %v1549_v35  ;;  %v3653_v39 = vld [vmem:[%s4654_s5 + $0x98] sm:$0xff]  }
 0x226   :  { %v4673_v43 = vld [vmem:[#allocation8_spill] sm:$0xff] }
 0x232   :  { %v2231_v53 = vpop.f32.mrf.mxu0 }
 0x233   :  { %v2270_v14 = vadd.f32 %v2231_v53, %v2027_v50  ;;  %v2012_v50 = vpop.f32.mrf.mxu1 }
 0x234   :  { %v2233_v12 = vpop.f32.mrf.mxu0 }
 0x235   :  { %v2271_v15 = vadd.f32 %v2233_v12, %v2028_v41  ;;  %v2014_v12 = vpop.f32.mrf.mxu1 }
 0x236   :  { %v2235_v19 = vpop.f32.mrf.mxu0  ;;  %v2038_v22 = vadd.f32 %v2014_v12, %v1795_v5  ;;  %v3645_v12 = vld [vmem:[%s4654_s5 + $0xb8] sm:$0xff]  }
 0x237   :  { %v2286_v45 = vmax.f32 %v2270_v14, %v2271_v15  ;;  %v2272_v27 = vadd.f32 %v2235_v19, %v2029_v18  ;;  %v2018_v25 = vpop.f32.mrf.mxu1  ;;  %v1551_v18 = vadd.f32 %v4510_v47, %v4500_v40 }
 0x238   :  { %v2237_v20 = vpop.f32.mrf.mxu0 }
 0x239   :  { %v2301_v24 = vadd.f32 %v4535_v17, %v2286_v45  ;;  %v2273_v41 = vadd.f32 %v2237_v20, %v2030_v46  ;;  %v2020_v37 = vpop.f32.mrf.mxu1  ;;  %v2037_v45 = vadd.f32 %v2012_v50, %v1794_v9  ;;  %v4668_v46 = vld [vmem:[#allocation7_spill] sm:$0xff] }
 0x23a   :  { %v2241_v53 = vpop.f32.mrf.mxu0  ;;  %v1797_v48 = vadd.f32 %v4668_v46, %v1551_v18  ;;  %v3652_v18 = vld [vmem:[%s4654_s5 + $0xd8] sm:$0xff]   ;;  %v3658_v46 = vld [vmem:[%s4654_s5 + $0xc0] sm:$0xff]  }
 0x23b   :  { %v2287_v58 = vmax.f32 %v2272_v27, %v2273_v41  ;;  %v2309_v31 = vmax.f32 %v2301_v24, 0.0  ;;  %v2274_v33 = vadd.f32 %v2241_v53, %v2031_v51  ;;  %v1553_v24 = vadd.f32 %v4670_v44, %v4669_v36  ;;  %v4671_v27 = vld [vmem:[#allocation3_spill] sm:$0xff]  ;;  %v4672_v41 = vld [vmem:[#allocation5_spill] sm:$0xff]  ;;  %v2022_v40 = vpop.f32.mrf.mxu1  ;;  %v3663_v44 = vld [vmem:[%s4656_s7 + $0x20] sm:$0xff]  }
 0x23c   :  { %v2243_v26 = vpop.f32.mrf.mxu0  ;;  %v1555_v49 = vadd.f32 %v4672_v41, %v4671_v27  ;;  %v2040_v32 = vadd.f32 %v2020_v37, %v1797_v48  ;;  %v3659_v48 = vld [vmem:[%s4654_s5 + $0x80] sm:$0xff]   ;;  %v3662_v36 = vld [vmem:[%s4656_s7 + $0x28] sm:$0xff]   ;;  %v3665_v27 = vld [vmem:[%s4656_s7 + $0x10] sm:$0xff]  }
 0x23d   :  { %v2302_v28 = vadd.f32 %v4535_v17, %v2287_v58  ;;  %v2275_v1 = vadd.f32 %v2243_v26, %v2032_v52  ;;  %v3275_v34 = vpack.c.bf16 %v2309_v31, %v2309_v31  ;;  %v2039_v52 = vadd.f32 %v2018_v25, %v1796_v23  ;;  %v2024_v54 = vpop.f32.mrf.mxu1  ;;  %v3655_v23 = vld [vmem:[%s4654_s5 + $0x90] sm:$0xff]   ;;  %v3666_v41 = vld [vmem:[%s4656_s7 + $0x8] sm:$0xff]  }
 0x23e   :  { %v2245_v38 = vpop.f32.mrf.mxu0  ;;  %v1798_v31 = vadd.f32 %v4673_v43, %v1553_v24  ;;  %v3664_v24 = vld [vmem:[%s4656_s7 + $0x18] sm:$0xff]  }
 0x23f   :  { %v2310_v11 = vmax.f32 %v2302_v28, 0.0  ;;  %v2288_v59 = vmax.f32 %v2274_v33, %v2275_v1  ;;  %v2276_v57 = vadd.f32 %v2245_v38, %v2033_v62  ;;  %v1799_v28 = vadd.f32 %v4528_v10, %v1555_v49  ;;  %v3667_v49 = vld [vmem:[%s4656_s7] sm:$0xff]  }
 0x240   :  { %v2247_v4 = vpop.f32.mrf.mxu0  ;;  %v2041_v10 = vadd.f32 %v2022_v40, %v1798_v31 }
 0x241   :  { %v3276_v6 = vpack.c.bf16 %v2310_v11, %v2310_v11  ;;  %v2303_v7 = vadd.f32 %v4535_v17, %v2288_v59  ;;  %v2277_v63 = vadd.f32 %v2247_v4, %v2034_v0  ;;  %v2042_v2 = vadd.f32 %v2024_v54, %v1799_v28  ;;  %v3647_v4 = vld [vmem:[%s4654_s5 + $0xb0] sm:$0xff]  }
 0x242   :  { %v2251_v60 = vpop.f32.mrf.mxu0 }
 0x243   :  { %v2349_v13 = vmax.bf16 %v3276_v6, %v3275_v34  ;;  %v2289_v14 = vmax.f32 %v2276_v57, %v2277_v63  ;;  %v2311_v42 = vmax.f32 %v2303_v7, 0.0  ;;  %v2278_v21 = vadd.f32 %v2251_v60, %v2035_v61  ;;  %v3648_v57 = vld [vmem:[%s4654_s5 + $0xe8] sm:$0xff]  }
 0x244   :  { %v2253_v15 = vpop.f32.mrf.mxu0 }
 0x245   :  { %v2304_v19 = vadd.f32 %v4535_v17, %v2289_v14  ;;  %v2279_v8 = vadd.f32 %v2253_v15, %v2036_v30  ;;  %v3277_v47 = vpack.c.bf16 %v2311_v42, %v2311_v42  ;;  %v3650_v30 = vld [vmem:[%s4654_s5 + $0xe0] sm:$0xff]  }
 0x246   :  { %v2255_v3 = vpop.f32.mrf.mxu0  ;;  %v3651_v15 = vld [vmem:[%s4654_s5 + $0xa0] sm:$0xff]  }
 0x247   :  { %v2312_v16 = vmax.f32 %v2304_v19, 0.0  ;;  %v2290_v20 = vmax.f32 %v2278_v21, %v2279_v8  ;;  %v2280_v51 = vadd.f32 %v2255_v3, %v2037_v45  ;;  %v3656_v45 = vld [vmem:[%s4654_s5 + $0xc8] sm:$0xff]  }
 0x248   :  { %v2257_v53 = vpop.f32.mrf.mxu0  ;;  %v3657_v3 = vld [vmem:[%s4654_s5 + $0x88] sm:$0xff]  }
 0x249   :  { %v3278_v56 = vpack.c.bf16 %v2312_v16, %v2312_v16  ;;  %v2305_v58 = vadd.f32 %v4535_v17, %v2290_v20  ;;  %v2281_v50 = vadd.f32 %v2257_v53, %v2038_v22  ;;  %v3668_v16 = vmov 0.0   ;;  %v3660_v20 = vld [vmem:[%s4656_s7 + $0x38] sm:$0xff]   ;;  %v3661_v22 = vld [vmem:[%s4656_s7 + $0x30] sm:$0xff]  }
 0x24a   :  { %v2261_v26 = vpop.f32.mrf.mxu0  ;;  %3336 = vmatprep.subr.bf16.mxu0 %v3668_v16  ;;  %3352 = vmatprep.mubr.msk.bf16.mxu0 %vm3669_vm3, %v3668_v16 }
 0x24b   :  { %v2291_v33 = vmax.f32 %v2280_v51, %v2281_v50  ;;  %v2350_v1 = vmax.bf16 %v3278_v56, %v3277_v47  ;;  %v2313_v62 = vmax.f32 %v2305_v58, 0.0  ;;  %v2282_v59 = vadd.f32 %v2261_v26, %v2039_v52  ;;  %3337 = vmatpush3.bf16.msra.mxu0 %v3660_v20  ;;  %v3209_v51 = vld [vmem:[%s4657_s6] ss:$0 sm:$0xff] }
 0x24c   :  { %v2263_v38 = vpop.f32.mrf.mxu0  ;;  %3338 = vmatprep.subr.bf16.mxu0 %v3668_v16 }
 0x24d   :  { %v2306_v11 = vadd.f32 %v4535_v17, %v2291_v33  ;;  %v2283_v0 = vadd.f32 %v2263_v38, %v2040_v32  ;;  %2648 = vmatprep.mubr.bf16.mxu1 %v2350_v1  ;;  %v3279_v6 = vpack.c.bf16 %v2313_v62, %v2313_v62 }
 0x24e   :  { %v2265_v29 = vpop.f32.mrf.mxu0  ;;  %2649 = vmatmul.mubr.bf16.vlgmr.msra.gmra.mxu1 %v2349_v13  ;;  %v3649_v13 = vld [vmem:[%s4654_s5 + $0xa8] sm:$0xff]  }
 0x24f   :  { %v2314_v25 = vmax.f32 %v2306_v11, 0.0  ;;  %v2292_v34 = vmax.f32 %v2282_v59, %v2283_v0  ;;  %3306 = vmatpush3.bf16.msra.mxu1 %v3645_v12  ;;  %v2284_v61 = vadd.f32 %v2265_v29, %v2041_v10  ;;  %3339 = vmatpush3.bf16.msra.mxu0 %v3661_v22  ;;  %v3242_v12 = vld [vmem:[%s4658_s8] ss:$0 sm:$0xff] }
 0x250   :  { %v2267_v7 = vpop.f32.mrf.mxu0  ;;  %3307 = vmatprep.subr.bf16.mxu1 %v3646_v55  ;;  %3340 = vmatprep.subr.bf16.mxu0 %v3668_v16 }
 0x251   :  { %v3280_v63 = vpack.c.bf16 %v2314_v25, %v2314_v25  ;;  %v2307_v9 = vadd.f32 %v4535_v17, %v2292_v34  ;;  %v2285_v60 = vadd.f32 %v2267_v7, %v2042_v2 }
 0x253   :  { %v2293_v5 = vmax.f32 %v2284_v61, %v2285_v60  ;;  %3308 = vmatpush3.bf16.msra.mxu1 %v3647_v4  ;;  %v2351_v14 = vmax.bf16 %v3280_v63, %v3279_v6  ;;  %v2315_v35 = vmax.f32 %v2307_v9, 0.0  ;;  %3341 = vmatpush3.bf16.msra.mxu0 %v3662_v36 }
 0x254   :  { %3309 = vmatprep.subr.bf16.mxu1 %v3648_v57  ;;  %3342 = vmatprep.subr.bf16.mxu0 %v3668_v16 }
 0x255   :  { %v2308_v37 = vadd.f32 %v4535_v17, %v2293_v5  ;;  %v3281_v19 = vpack.c.bf16 %v2315_v35, %v2315_v35  ;;  %v3654_v17 = vld [vmem:[%s4654_s5 + $0xd0] sm:$0xff]  }
 0x257   :  { %v2316_v42 = vmax.f32 %v2308_v37, 0.0  ;;  %3310 = vmatpush3.bf16.msra.mxu1 %v3649_v13  ;;  %3343 = vmatpush3.bf16.msra.mxu0 %v3663_v44 }
 0x258   :  { %3311 = vmatprep.subr.bf16.mxu1 %v3650_v30  ;;  %3344 = vmatprep.subr.bf16.mxu0 %v3668_v16 }
 0x259   :  { %v3282_v21 = vpack.c.bf16 %v2316_v42, %v2316_v42 }
 0x25b   :  { %3312 = vmatpush3.bf16.msra.mxu1 %v3651_v15  ;;  %v2352_v8 = vmax.bf16 %v3282_v21, %v3281_v19  ;;  %3345 = vmatpush3.bf16.msra.mxu0 %v3664_v24 }
 0x25c   :  { %3313 = vmatprep.subr.bf16.mxu1 %v3652_v18  ;;  %3346 = vmatprep.subr.bf16.mxu0 %v3668_v16 }
 0x25d   :  { %2688 = vmatprep.mubr.bf16.mxu1 %v2352_v8 }
 0x25f   :  { %3314 = vmatpush3.bf16.msra.mxu1 %v3653_v39  ;;  %3347 = vmatpush3.bf16.msra.mxu0 %v3665_v27 }
 0x260   :  { %3315 = vmatprep.subr.bf16.mxu1 %v3654_v17  ;;  %3348 = vmatprep.subr.bf16.mxu0 %v3668_v16 }
 0x263   :  { %3316 = vmatpush3.bf16.msra.mxu1 %v3655_v23  ;;  %3349 = vmatpush3.bf16.msra.mxu0 %v3666_v41 }
 0x264   :  { %3317 = vmatprep.subr.bf16.mxu1 %v3656_v45  ;;  %3350 = vmatprep.subr.bf16.mxu0 %v3668_v16 }
 0x267   :  { %3318 = vmatpush3.bf16.msra.mxu1 %v3657_v3  ;;  %3351 = vmatpush3.bf16.msra.mxu0 %v3667_v49 }
 0x268   :  { %3319 = vmatprep.subr.bf16.mxu1 %v3658_v46 }
 0x26b   :  { %3320 = vmatpush3.bf16.msra.mxu1 %v3659_v48 }
 0x26e   :  { %2689 = vmatmul.mubr.bf16.vlgmr.msra.gmra.mxu1 %v2351_v14 }
 0x30e   :  { %v3299_v40 = vpop.f32.mrf.mxu1 }
 0x310   :  { %v3300_v47 = vpop.f32.mrf.mxu1 }
 0x311   :  { %v3301_v58 = vadd.f32 %v3300_v47, %v3299_v40 }
 0x312   :  { %v3302_v53 = vpop.f32.mrf.mxu1 }
 0x313   :  { %v2651_v43 = vadd.f32 %v3301_v58, %v3209_v51 }
 0x314   :  { %v3303_v56 = vpop.f32.mrf.mxu1 }
 0x32e   :  { %v3321_v50 = vpop.f32.mrf.mxu1 }
 0x330   :  { %v3322_v52 = vpop.f32.mrf.mxu1 }
 0x331   :  { %v3323_v31 = vadd.f32 %v3322_v52, %v3321_v50 }
 0x332   :  { %v3324_v26 = vpop.f32.mrf.mxu1 }
 0x333   :  { %v2691_v32 = vadd.f32 %v3323_v31, %v2651_v43 }
 0x334   :  { %v3325_v28 = vpop.f32.mrf.mxu1 }
 0x335   :  { %v2696_v33 = vmax.f32 %v2691_v32, 0.0 }
 0x337   :  { %v2697_v1 = vpack.c.bf16 %v2696_v33, %v2696_v33 }
 0x339   :  { %3353 = vmatmul.mubr.bf16.vlgmr.msra.gmra.mxu0 %v2697_v1 }
 0x3f9   :  { %v2803_v54 = vpop.f32.mrf.mxu0 }
 0x3fa   :  { %v2804_v62 = vadd.f32 %v3242_v12, %v2803_v54 }
 0x3fb   :  { %v3354_v38 = vpop.f32.mrf.mxu0 }
 0x3fc   :  { %2809 = vst [vmem:[%s4659_s9] sm:$0xff] %v2804_v62 }
 0x3fd   :  { %v2806_v55 = vpop.f32.mrf.mxu0 }
 0x3ff   :  { %v3355_v11 = vpop.f32.mrf.mxu0 }

</bundles_post_ra>
